<compile_context>
chip_gen: v6e
topology: v6e:2x2x1
jax: 0.10.0
libtpu: 0.0.40
codegen_flags: <defaults>
</compile_context>

<pallas_src>
import functools

import jax
import jax.numpy as jnp
from jax import lax
from jax.experimental import pallas as pl
from jax.experimental.pallas import tpu as pltpu


# ----------------------------------------------------------------------------
# Fused Pallas kernel: the full DeepSet layer stack on one (GB*N, F) block
# ----------------------------------------------------------------------------
def _deepset_fused_kernel(x_ref, sum_ref, bcast_ref, *refs, n_layers, apply_act):
    """refs = (w12_0, w2n_0, b2_0, ..., w12_{L-1}, w2n_{L-1}, b2_{L-1}, o_ref)."""
    o_ref = refs[-1]
    p_refs = refs[:-1]

    x = x_ref[...]                       # (R, Fin) bf16, R = GB*N node rows
    sum_mat = sum_ref[...]               # (GB, R)  bf16: per-graph row-sum matrix
    bcast_mat = bcast_ref[...]           # (R, GB)  bf16: per-graph row-broadcast

    for i in range(n_layers):
        w12 = p_refs[3 * i][...]         # (Fin, Fout) bf16 = W1 + W2
        w2n = p_refs[3 * i + 1][...]     # (Fin, Fout) f32  = W2 / N
        b2 = p_refs[3 * i + 2][...]      # (1,  Fout) f32

        # dgl.mean_nodes + broadcast_nodes folded into an effective per-graph
        # bias:  b_eff[g] = b2 - mean_g @ W2 = b2 - sum_g @ (W2 / N)
        # TODO(synk): DGL-style padded/ragged graphs would need a masked sum.
        sum_g = jnp.dot(sum_mat, x,
                        preferred_element_type=jnp.float32)          # (GB, Fin)
        b_eff = b2 - jnp.dot(sum_g, w2n,
                             preferred_element_type=jnp.float32)     # (GB, Fout)

        # One bf16 MXU matmul over all GB*N node rows, plus the per-graph bias
        # broadcast as a second small matmul -- no in-kernel reshapes.
        y = jnp.dot(x, w12, preferred_element_type=jnp.float32)      # (R, Fout)
        y = y + jnp.dot(bcast_mat, b_eff.astype(jnp.bfloat16),
                        preferred_element_type=jnp.float32)

        # x = x / torch.norm(x, p='fro', dim=1, keepdim=True): row-wise L2 norm.
        # No epsilon (matches reference; all-zero rows -> inf/NaN).
        sumsq = jnp.sum(y * y, axis=-1, keepdims=True)
        y = y * lax.rsqrt(sumsq)

        if apply_act[i]:
            y = jnp.maximum(y, 0.0)      # nn.ReLU (all layers but the last)

        x = y.astype(jnp.bfloat16)       # bf16 activations between fused layers

    o_ref[...] = x.astype(o_ref.dtype)


# ----------------------------------------------------------------------------
# Wrapper: one pallas_call for the whole DeepSet forward
# ----------------------------------------------------------------------------
def deepset_forward(x, params, *, graphs_per_block=128, min_grid_steps=2):
    """Fused DeepSet forward (all layers use_attention=False).

    x      : (B, N, inputsize) float32 node features ('node input').
    params : list of (w1, w2, b2) per DeepSetLayer; weights in (in, out) layout,
             b2 shape (1, out).
    returns (B, N, outputsize) bfloat16  -- 'node hidden rep'.
    """
    B, N, Fin = x.shape
    n_layers = len(params)
    apply_act = tuple(i < n_layers - 1 for i in range(n_layers))  # last: no ReLU
    Fout_last = params[-1][0].shape[1]

    # --- block-size selection -------------------------------------------------
    # GB graphs per grid step.  min_grid_steps>=2 keeps both v7x TensorCores busy
    # (near-free on single-TC v6e/v5e).  Note the constant sum/broadcast matrices
    # grow as GB^2 * N, so keep GB in the low hundreds.
    GB = max(1, min(graphs_per_block, B))
    if min_grid_steps > 1:
        GB = max(1, min(GB, pl.cdiv(B, min_grid_steps)))
    # bf16 sublane packing: (GB*N) must be a multiple of 16 (or the full dim).
    while (GB * N) % 16 != 0:
        GB += 1
    n_blocks = pl.cdiv(B, GB)
    B_pad = n_blocks * GB               # pad B instead of shrinking GB to a divisor
    R = GB * N

    # --- inputs: 2-D flatten, zero-pad, bf16 -----------------------------------
    x2 = x.reshape(B * N, Fin)
    if B_pad > B:
        x2 = jnp.pad(x2, ((0, (B_pad - B) * N), (0, 0)))
    x2 = x2.astype(jnp.bfloat16)

    # Constant 0/1 matrices: per-graph sum and per-graph broadcast (exact in bf16).
    row_graph = jnp.arange(R, dtype=jnp.int32) // N
    graph_ids = jnp.arange(GB, dtype=jnp.int32)
    sum_mat = (graph_ids[:, None] == row_graph[None, :]).astype(jnp.bfloat16)   # (GB, R)
    bcast_mat = sum_mat.T                                                        # (R, GB)

    # Host-side folds: W12 = W1 + W2 (bf16 for the MXU), W2/N and b2 kept f32.
    flat_params = []
    for (w1, w2, b2) in params:
        flat_params.append((w1 + w2).astype(jnp.bfloat16))
        flat_params.append((w2 / float(N)).astype(jnp.float32))
        flat_params.append(b2.astype(jnp.float32).reshape(1, -1))

    in_specs = [
        pl.BlockSpec((R, Fin), lambda b: (b, 0)),
        pl.BlockSpec(sum_mat.shape, lambda b: (0, 0)),     # same block every step
        pl.BlockSpec(bcast_mat.shape, lambda b: (0, 0)),
    ]
    for p in flat_params:
        in_specs.append(pl.BlockSpec(p.shape, lambda b: (0, 0)))

    # --- VMEM budget (v7x has only 64 MiB physical per TC) ---------------------
    feat_sizes = [Fin] + [w1.shape[1] for (w1, _, _) in params]
    max_f = max(feat_sizes)
    vmem_est = (
        2 * 2 * R * (Fin + Fout_last) * 2                   # double-buffered I/O (bf16)
        + sum_mat.size * 2 + bcast_mat.size * 2             # constant bf16 matrices
        + sum(int(p.size) * p.dtype.itemsize for p in flat_params)
        + 6 * R * max_f * 4                                 # live activation temporaries
    )
    vmem_limit = int(min(max(2 * vmem_est, 32 * 1024 * 1024), 48 * 1024 * 1024))

    kernel = functools.partial(_deepset_fused_kernel,
                               n_layers=n_layers, apply_act=apply_act)

    out2 = pl.pallas_call(
        kernel,
        out_shape=jax.ShapeDtypeStruct((B_pad * N, Fout_last), jnp.bfloat16),
        grid_spec=pltpu.PrefetchScalarGridSpec(
            num_scalar_prefetch=0,
            grid=(n_blocks,),
            in_specs=in_specs,
            out_specs=pl.BlockSpec((R, Fout_last), lambda b: (b, 0)),
        ),
        compiler_params=pltpu.CompilerParams(
            dimension_semantics=("parallel",),
            vmem_limit_bytes=vmem_limit,
        ),
    )(x2, sum_mat, bcast_mat, *flat_params)

    return out2[: B * N].reshape(B, N, Fout_last)


# ----------------------------------------------------------------------------
# Parameter init matching DeepSet.__init__ shapes
# ----------------------------------------------------------------------------
def init_deepset_params(key, config):
    """Layer sizes: inputsize -> layers[0] -> ... -> layers[-1] -> outputsize.
    Each layer: layer1 (Fin, Fout) no-bias, layer2 (Fin, Fout) + bias (1, Fout)."""
    sizes = [config["inputsize"]] + list(config["layers"]) + [config["outputsize"]]
    params = []
    for i in range(len(sizes) - 1):
        fin, fout = sizes[i], sizes[i + 1]
        key, k1, k2, k3 = jax.random.split(key, 4)
        scale = 1.0 / jnp.sqrt(jnp.float32(fin))
        w1 = jax.random.uniform(k1, (fin, fout), jnp.float32, -scale, scale)
        w2 = jax.random.uniform(k2, (fin, fout), jnp.float32, -scale, scale)
        b2 = jax.random.uniform(k3, (1, fout), jnp.float32, -scale, scale)
        params.append((w1, w2, b2))
    return params


# ----------------------------------------------------------------------------
# Pure-JAX reference (unfused, exactly the PyTorch math) for correctness check
# ----------------------------------------------------------------------------
def _ref_forward(x, params):
    n_layers = len(params)
    for i, (w1, w2, b2) in enumerate(params):
        mean = jnp.mean(x, axis=1, keepdims=True)
        y = x @ w1 + (x - mean) @ w2 + b2[None, :, :]
        y = y / jnp.linalg.norm(y, axis=-1, keepdims=True)
        if i < n_layers - 1:
            y = jnp.maximum(y, 0.0)
        x = y
    return x


if __name__ == "__main__":
    config = {
        "inputsize": 16,
        "layers": [32, 32],
        "outputsize": 16,
        "inputs": ["node input"],
    }

    B, N = 64, 8  # 64 graphs, 8 'particles' nodes each -> grid of 2 steps (GB=32)
    key = jax.random.PRNGKey(0)
    key, kx = jax.random.split(key)
    x = jax.random.normal(kx, (B, N, config["inputsize"]), jnp.float32)

    params = init_deepset_params(key, config)

    out = deepset_forward(x, params)
    out = jax.block_until_ready(out)

    # Reference in f32, fed the bf16-quantized inputs (the kernel's HBM dtype);
    # remaining delta is the bf16 weight/activation rounding inside the kernel.
    x_q = x.astype(jnp.bfloat16).astype(jnp.float32)
    ref = _ref_forward(x_q, params)

    assert out.shape == (B, N, config["outputsize"])
    assert jnp.allclose(out.astype(jnp.float32), ref, atol=2e-2, rtol=2e-2), \
        "mismatch vs reference"

    print("KERNEL_OK")
</pallas_src>

<mosaic_0001>
module attributes {stable_mosaic.version = 11 : i64} {
  func.func @_deepset_fused_kernel(%arg0: i32, %arg1: memref<256x16xbf16, #tpu.memory_space<vmem>>, %arg2: memref<32x256xbf16, #tpu.memory_space<vmem>>, %arg3: memref<256x32xbf16, #tpu.memory_space<vmem>>, %arg4: memref<16x32xbf16, #tpu.memory_space<vmem>>, %arg5: memref<16x32xf32, #tpu.memory_space<vmem>>, %arg6: memref<1x32xf32, #tpu.memory_space<vmem>>, %arg7: memref<32x32xbf16, #tpu.memory_space<vmem>>, %arg8: memref<32x32xf32, #tpu.memory_space<vmem>>, %arg9: memref<1x32xf32, #tpu.memory_space<vmem>>, %arg10: memref<32x16xbf16, #tpu.memory_space<vmem>>, %arg11: memref<32x16xf32, #tpu.memory_space<vmem>>, %arg12: memref<1x16xf32, #tpu.memory_space<vmem>>, %arg13: memref<256x16xbf16, #tpu.memory_space<vmem>>) attributes {dimension_semantics = [#tpu.dimension_semantics<parallel>], iteration_bounds = array<i64: 2>, scalar_prefetch = 0 : i64, scratch_operands = 0 : i64, tpu.core_type = #tpu.core_type<tc>, window_params = [{transform_indices = @transform_0, window_bounds = array<i64: 256, 16>}, {pipeline_mode = #tpu.pipeline_mode<synchronous>, transform_indices = @transform_1, window_bounds = array<i64: 32, 256>}, {pipeline_mode = #tpu.pipeline_mode<synchronous>, transform_indices = @transform_2, window_bounds = array<i64: 256, 32>}, {pipeline_mode = #tpu.pipeline_mode<synchronous>, transform_indices = @transform_3, window_bounds = array<i64: 16, 32>}, {pipeline_mode = #tpu.pipeline_mode<synchronous>, transform_indices = @transform_4, window_bounds = array<i64: 16, 32>}, {pipeline_mode = #tpu.pipeline_mode<synchronous>, transform_indices = @transform_5, window_bounds = array<i64: 1, 32>}, {pipeline_mode = #tpu.pipeline_mode<synchronous>, transform_indices = @transform_6, window_bounds = array<i64: 32, 32>}, {pipeline_mode = #tpu.pipeline_mode<synchronous>, transform_indices = @transform_7, window_bounds = array<i64: 32, 32>}, {pipeline_mode = #tpu.pipeline_mode<synchronous>, transform_indices = @transform_8, window_bounds = array<i64: 1, 32>}, {pipeline_mode = #tpu.pipeline_mode<synchronous>, transform_indices = @transform_9, window_bounds = array<i64: 32, 16>}, {pipeline_mode = #tpu.pipeline_mode<synchronous>, transform_indices = @transform_10, window_bounds = array<i64: 32, 16>}, {pipeline_mode = #tpu.pipeline_mode<synchronous>, transform_indices = @transform_11, window_bounds = array<i64: 1, 16>}, {transform_indices = @transform_12, window_bounds = array<i64: 256, 16>}]} {
    %c0 = arith.constant 0 : index
    %c0_0 = arith.constant 0 : index
    %0 = vector.load %arg1[%c0, %c0_0] : memref<256x16xbf16, #tpu.memory_space<vmem>>, vector<256x16xbf16>
    %c0_1 = arith.constant 0 : index
    %c0_2 = arith.constant 0 : index
    %1 = vector.load %arg2[%c0_1, %c0_2] : memref<32x256xbf16, #tpu.memory_space<vmem>>, vector<32x256xbf16>
    %c0_3 = arith.constant 0 : index
    %c0_4 = arith.constant 0 : index
    %2 = vector.load %arg3[%c0_3, %c0_4] : memref<256x32xbf16, #tpu.memory_space<vmem>>, vector<256x32xbf16>
    %c0_5 = arith.constant 0 : index
    %c0_6 = arith.constant 0 : index
    %3 = vector.load %arg4[%c0_5, %c0_6] : memref<16x32xbf16, #tpu.memory_space<vmem>>, vector<16x32xbf16>
    %c0_7 = arith.constant 0 : index
    %c0_8 = arith.constant 0 : index
    %4 = vector.load %arg5[%c0_7, %c0_8] : memref<16x32xf32, #tpu.memory_space<vmem>>, vector<16x32xf32>
    %c0_9 = arith.constant 0 : index
    %c0_10 = arith.constant 0 : index
    %5 = vector.load %arg6[%c0_9, %c0_10] : memref<1x32xf32, #tpu.memory_space<vmem>>, vector<1x32xf32>
    %cst = arith.constant dense<0.000000e+00> : vector<32x16xf32>
    %6 = tpu.matmul %1, %0, %cst {dimension_numbers = #tpu.dot_dimension_numbers<[1], [0], [0], [1], [0, 0, 1, 1], [], []>} : vector<32x256xbf16>, vector<256x16xbf16>, vector<32x16xf32> -> vector<32x16xf32>
    %cst_11 = arith.constant dense<0.000000e+00> : vector<32x32xf32>
    %7 = tpu.matmul %6, %4, %cst_11 {dimension_numbers = #tpu.dot_dimension_numbers<[1], [0], [0], [1], [0, 0, 1, 1], [], []>} : vector<32x16xf32>, vector<16x32xf32>, vector<32x32xf32> -> vector<32x32xf32>
    %8 = vector.broadcast %5 : vector<1x32xf32> to vector<32x32xf32>
    %9 = arith.subf %8, %7 : vector<32x32xf32>
    %cst_12 = arith.constant dense<0.000000e+00> : vector<256x32xf32>
    %10 = tpu.matmul %0, %3, %cst_12 {dimension_numbers = #tpu.dot_dimension_numbers<[1], [0], [0], [1], [0, 0, 1, 1], [], []>} : vector<256x16xbf16>, vector<16x32xbf16>, vector<256x32xf32> -> vector<256x32xf32>
    %11 = arith.truncf %9 : vector<32x32xf32> to vector<32x32xbf16>
    %cst_13 = arith.constant dense<0.000000e+00> : vector<256x32xf32>
    %12 = tpu.matmul %2, %11, %cst_13 {dimension_numbers = #tpu.dot_dimension_numbers<[1], [0], [0], [1], [0, 0, 1, 1], [], []>} : vector<256x32xbf16>, vector<32x32xbf16>, vector<256x32xf32> -> vector<256x32xf32>
    %13 = arith.addf %10, %12 : vector<256x32xf32>
    %14 = arith.mulf %13, %13 : vector<256x32xf32>
    %cst_14 = arith.constant dense<0.000000e+00> : vector<256xf32>
    %15 = vector.multi_reduction <add>, %14, %cst_14 [1] : vector<256x32xf32> to vector<256xf32>
    %16 = vector.shape_cast %15 : vector<256xf32> to vector<256x1xf32>
    %17 = math.rsqrt %16 : vector<256x1xf32>
    %18 = vector.broadcast %17 : vector<256x1xf32> to vector<256x32xf32>
    %19 = arith.mulf %13, %18 : vector<256x32xf32>
    %cst_15 = arith.constant 0.000000e+00 : f32
    %20 = vector.broadcast %cst_15 : f32 to vector<256x32xf32>
    %21 = arith.maximumf %19, %20 : vector<256x32xf32>
    %22 = arith.truncf %21 : vector<256x32xf32> to vector<256x32xbf16>
    %c0_16 = arith.constant 0 : index
    %c0_17 = arith.constant 0 : index
    %23 = vector.load %arg7[%c0_16, %c0_17] : memref<32x32xbf16, #tpu.memory_space<vmem>>, vector<32x32xbf16>
    %c0_18 = arith.constant 0 : index
    %c0_19 = arith.constant 0 : index
    %24 = vector.load %arg8[%c0_18, %c0_19] : memref<32x32xf32, #tpu.memory_space<vmem>>, vector<32x32xf32>
    %c0_20 = arith.constant 0 : index
    %c0_21 = arith.constant 0 : index
    %25 = vector.load %arg9[%c0_20, %c0_21] : memref<1x32xf32, #tpu.memory_space<vmem>>, vector<1x32xf32>
    %cst_22 = arith.constant dense<0.000000e+00> : vector<32x32xf32>
    %26 = tpu.matmul %1, %22, %cst_22 {dimension_numbers = #tpu.dot_dimension_numbers<[1], [0], [0], [1], [0, 0, 1, 1], [], []>} : vector<32x256xbf16>, vector<256x32xbf16>, vector<32x32xf32> -> vector<32x32xf32>
    %cst_23 = arith.constant dense<0.000000e+00> : vector<32x32xf32>
    %27 = tpu.matmul %26, %24, %cst_23 {dimension_numbers = #tpu.dot_dimension_numbers<[1], [0], [0], [1], [0, 0, 1, 1], [], []>} : vector<32x32xf32>, vector<32x32xf32>, vector<32x32xf32> -> vector<32x32xf32>
    %28 = vector.broadcast %25 : vector<1x32xf32> to vector<32x32xf32>
    %29 = arith.subf %28, %27 : vector<32x32xf32>
    %cst_24 = arith.constant dense<0.000000e+00> : vector<256x32xf32>
    %30 = tpu.matmul %22, %23, %cst_24 {dimension_numbers = #tpu.dot_dimension_numbers<[1], [0], [0], [1], [0, 0, 1, 1], [], []>} : vector<256x32xbf16>, vector<32x32xbf16>, vector<256x32xf32> -> vector<256x32xf32>
    %31 = arith.truncf %29 : vector<32x32xf32> to vector<32x32xbf16>
    %cst_25 = arith.constant dense<0.000000e+00> : vector<256x32xf32>
    %32 = tpu.matmul %2, %31, %cst_25 {dimension_numbers = #tpu.dot_dimension_numbers<[1], [0], [0], [1], [0, 0, 1, 1], [], []>} : vector<256x32xbf16>, vector<32x32xbf16>, vector<256x32xf32> -> vector<256x32xf32>
    %33 = arith.addf %30, %32 : vector<256x32xf32>
    %34 = arith.mulf %33, %33 : vector<256x32xf32>
    %cst_26 = arith.constant dense<0.000000e+00> : vector<256xf32>
    %35 = vector.multi_reduction <add>, %34, %cst_26 [1] : vector<256x32xf32> to vector<256xf32>
    %36 = vector.shape_cast %35 : vector<256xf32> to vector<256x1xf32>
    %37 = math.rsqrt %36 : vector<256x1xf32>
    %38 = vector.broadcast %37 : vector<256x1xf32> to vector<256x32xf32>
    %39 = arith.mulf %33, %38 : vector<256x32xf32>
    %cst_27 = arith.constant 0.000000e+00 : f32
    %40 = vector.broadcast %cst_27 : f32 to vector<256x32xf32>
    %41 = arith.maximumf %39, %40 : vector<256x32xf32>
    %42 = arith.truncf %41 : vector<256x32xf32> to vector<256x32xbf16>
    %c0_28 = arith.constant 0 : index
    %c0_29 = arith.constant 0 : index
    %43 = vector.load %arg10[%c0_28, %c0_29] : memref<32x16xbf16, #tpu.memory_space<vmem>>, vector<32x16xbf16>
    %c0_30 = arith.constant 0 : index
    %c0_31 = arith.constant 0 : index
    %44 = vector.load %arg11[%c0_30, %c0_31] : memref<32x16xf32, #tpu.memory_space<vmem>>, vector<32x16xf32>
    %c0_32 = arith.constant 0 : index
    %c0_33 = arith.constant 0 : index
    %45 = vector.load %arg12[%c0_32, %c0_33] : memref<1x16xf32, #tpu.memory_space<vmem>>, vector<1x16xf32>
    %cst_34 = arith.constant dense<0.000000e+00> : vector<32x32xf32>
    %46 = tpu.matmul %1, %42, %cst_34 {dimension_numbers = #tpu.dot_dimension_numbers<[1], [0], [0], [1], [0, 0, 1, 1], [], []>} : vector<32x256xbf16>, vector<256x32xbf16>, vector<32x32xf32> -> vector<32x32xf32>
    %cst_35 = arith.constant dense<0.000000e+00> : vector<32x16xf32>
    %47 = tpu.matmul %46, %44, %cst_35 {dimension_numbers = #tpu.dot_dimension_numbers<[1], [0], [0], [1], [0, 0, 1, 1], [], []>} : vector<32x32xf32>, vector<32x16xf32>, vector<32x16xf32> -> vector<32x16xf32>
    %48 = vector.broadcast %45 : vector<1x16xf32> to vector<32x16xf32>
    %49 = arith.subf %48, %47 : vector<32x16xf32>
    %cst_36 = arith.constant dense<0.000000e+00> : vector<256x16xf32>
    %50 = tpu.matmul %42, %43, %cst_36 {dimension_numbers = #tpu.dot_dimension_numbers<[1], [0], [0], [1], [0, 0, 1, 1], [], []>} : vector<256x32xbf16>, vector<32x16xbf16>, vector<256x16xf32> -> vector<256x16xf32>
    %51 = arith.truncf %49 : vector<32x16xf32> to vector<32x16xbf16>
    %cst_37 = arith.constant dense<0.000000e+00> : vector<256x16xf32>
    %52 = tpu.matmul %2, %51, %cst_37 {dimension_numbers = #tpu.dot_dimension_numbers<[1], [0], [0], [1], [0, 0, 1, 1], [], []>} : vector<256x32xbf16>, vector<32x16xbf16>, vector<256x16xf32> -> vector<256x16xf32>
    %53 = arith.addf %50, %52 : vector<256x16xf32>
    %54 = arith.mulf %53, %53 : vector<256x16xf32>
    %cst_38 = arith.constant dense<0.000000e+00> : vector<256xf32>
    %55 = vector.multi_reduction <add>, %54, %cst_38 [1] : vector<256x16xf32> to vector<256xf32>
    %56 = vector.shape_cast %55 : vector<256xf32> to vector<256x1xf32>
    %57 = math.rsqrt %56 : vector<256x1xf32>
    %58 = vector.broadcast %57 : vector<256x1xf32> to vector<256x16xf32>
    %59 = arith.mulf %53, %58 : vector<256x16xf32>
    %60 = arith.truncf %59 : vector<256x16xf32> to vector<256x16xbf16>
    %c0_39 = arith.constant 0 : index
    %c0_40 = arith.constant 0 : index
    %61 = vector.load %arg13[%c0_39, %c0_40] : memref<256x16xbf16, #tpu.memory_space<vmem>>, vector<256x16xbf16>
    tpu.vector_store %arg13[%c0_39, %c0_40], %60 {strides = array<i32>} : memref<256x16xbf16, #tpu.memory_space<vmem>>, vector<256x16xbf16>,
    return
  }
  func.func @transform_0(%arg0: i32) -> (i32, i32) {
    %c0_i32 = arith.constant 0 : i32
    %c0_i32_0 = arith.constant 0 : i32
    return %arg0, %c0_i32 : i32, i32
  }
  func.func @transform_1(%arg0: i32) -> (i32, i32) {
    %c0_i32 = arith.constant 0 : i32
    %c0_i32_0 = arith.constant 0 : i32
    %c0_i32_1 = arith.constant 0 : i32
    return %c0_i32, %c0_i32_0 : i32, i32
  }
  func.func @transform_2(%arg0: i32) -> (i32, i32) {
    %c0_i32 = arith.constant 0 : i32
    %c0_i32_0 = arith.constant 0 : i32
    %c0_i32_1 = arith.constant 0 : i32
    return %c0_i32, %c0_i32_0 : i32, i32
  }
  func.func @transform_3(%arg0: i32) -> (i32, i32) {
    %c0_i32 = arith.constant 0 : i32
    %c0_i32_0 = arith.constant 0 : i32
    %c0_i32_1 = arith.constant 0 : i32
    return %c0_i32, %c0_i32_0 : i32, i32
  }
  func.func @transform_4(%arg0: i32) -> (i32, i32) {
    %c0_i32 = arith.constant 0 : i32
    %c0_i32_0 = arith.constant 0 : i32
    %c0_i32_1 = arith.constant 0 : i32
    return %c0_i32, %c0_i32_0 : i32, i32
  }
  func.func @transform_5(%arg0: i32) -> (i32, i32) {
    %c0_i32 = arith.constant 0 : i32
    %c0_i32_0 = arith.constant 0 : i32
    %c0_i32_1 = arith.constant 0 : i32
    return %c0_i32, %c0_i32_0 : i32, i32
  }
  func.func @transform_6(%arg0: i32) -> (i32, i32) {
    %c0_i32 = arith.constant 0 : i32
    %c0_i32_0 = arith.constant 0 : i32
    %c0_i32_1 = arith.constant 0 : i32
    return %c0_i32, %c0_i32_0 : i32, i32
  }
  func.func @transform_7(%arg0: i32) -> (i32, i32) {
    %c0_i32 = arith.constant 0 : i32
    %c0_i32_0 = arith.constant 0 : i32
    %c0_i32_1 = arith.constant 0 : i32
    return %c0_i32, %c0_i32_0 : i32, i32
  }
  func.func @transform_8(%arg0: i32) -> (i32, i32) {
    %c0_i32 = arith.constant 0 : i32
    %c0_i32_0 = arith.constant 0 : i32
    %c0_i32_1 = arith.constant 0 : i32
    return %c0_i32, %c0_i32_0 : i32, i32
  }
  func.func @transform_9(%arg0: i32) -> (i32, i32) {
    %c0_i32 = arith.constant 0 : i32
    %c0_i32_0 = arith.constant 0 : i32
    %c0_i32_1 = arith.constant 0 : i32
    return %c0_i32, %c0_i32_0 : i32, i32
  }
  func.func @transform_10(%arg0: i32) -> (i32, i32) {
    %c0_i32 = arith.constant 0 : i32
    %c0_i32_0 = arith.constant 0 : i32
    %c0_i32_1 = arith.constant 0 : i32
    return %c0_i32, %c0_i32_0 : i32, i32
  }
  func.func @transform_11(%arg0: i32) -> (i32, i32) {
    %c0_i32 = arith.constant 0 : i32
    %c0_i32_0 = arith.constant 0 : i32
    %c0_i32_1 = arith.constant 0 : i32
    return %c0_i32, %c0_i32_0 : i32, i32
  }
  func.func @transform_12(%arg0: i32) -> (i32, i32) {
    %c0_i32 = arith.constant 0 : i32
    %c0_i32_0 = arith.constant 0 : i32
    return %arg0, %c0_i32 : i32, i32
  }
}

</mosaic_0001>

<bundles_post_ra>
// kernel: tpu_custom_call.1
= control target key start
LH: loop header
LB: loop body
LE: loop exit
PB: predicated region body
PF: predicated region fallthrough
CT: control target
= control target key end

     0   :  { %s4286_s21 = smov 0   ;;  %s5599_s0 = inlined_call_operand.vmem [shape: bf16[512,16], index: 0, kind: input, shape index: {}]   ;;  %s5600_s1 = inlined_call_operand.vmem [shape: bf16[32,256], index: 1, kind: input, shape index: {}]   ;;  %s5601_s2 = inlined_call_operand.vmem [shape: bf16[256,32], index: 2, kind: input, shape index: {}]   ;;  %s5602_s3 = inlined_call_operand.vmem [shape: bf16[16,32], index: 3, kind: input, shape index: {}]   ;;  %s5603_s4 = inlined_call_operand.vmem [shape: f32[16,32], index: 4, kind: input, shape index: {}]   ;;  %s5604_s5 = inlined_call_operand.vmem [shape: f32[1,32], index: 5, kind: input, shape index: {}]   ;;  %s5605_s6 = inlined_call_operand.vmem [shape: bf16[32,32], index: 6, kind: input, shape index: {}]   ;;  %s5606_s7 = inlined_call_operand.vmem [shape: f32[32,32], index: 7, kind: input, shape index: {}]   ;;  %s5607_s8 = inlined_call_operand.vmem [shape: f32[1,32], index: 8, kind: input, shape index: {}]   ;;  %s5608_s9 = inlined_call_operand.vmem [shape: bf16[32,16], index: 9, kind: input, shape index: {}]   ;;  %s5609_s10 = inlined_call_operand.vmem [shape: f32[32,16], index: 10, kind: input, shape index: {}]   ;;  %s5610_s11 = inlined_call_operand.vmem [shape: f32[1,16], index: 11, kind: input, shape index: {}]   ;;  %s5611_s12 = inlined_call_operand.vmem [shape: bf16[512,16], index: 12, kind: output, shape index: {}]  }
   0x1 LB: > { %s3258_s22 = sadd.s32 4294967295, %s4219_s21   ;;  %p3262_p0 = scmp.ge.s32.totalorder %s4219_s21, 1  ;;  %s4219_s21 = sphi %s4286_s21, %s22_s21  }
   0x2   : > { %p363_p1 = scmp.lt.s32.totalorder %s4219_s21, 3 }
   0x4   : > { %p364_p2 = pnand %p3262_p0, %p363_p1 }
   0x6   : > { %367 = sbr.rel (%p364_p2) target bundleno = 2627 (0xa43), region = 68 }
   0xb   : > { %s3263_s23 = sshll.u32 %s3258_s22, 5  ;;  %v4297_v0 = vld [vmem:[%s5600_s1 + $0x4] ss:$8 sps:$4 sm:$0xff]   ;;  %v4335_v17 = vld [vmem:[%s5600_s1] ss:$8 sps:$4 sm:$0xff]   ;;  %vm656_vm0 = vcmask 130048  }
   0xc   : > { %p406_p3 = scmp.lt.s32.totalorder %s3263_s23, 63  ;;  %639 = vmatprep.mubr.bf16.mxu0 %v4297_v0  ;;  %v4340_v18 = vld [vmem:[%s5600_s1 + $0x14] ss:$8 sps:$4 sm:$0xff]   ;;  %v4347_v19 = vld [vmem:[%s5600_s1 + $0x10] ss:$8 sps:$4 sm:$0xff]   ;;  %v489_v20 = vld [vmem:[%s5603_s4 + $0x8] sm:$0xff] }
   0xd   : > { %3698 = vmatprep.subr.mxu1 %v489_v20  ;;  %v488_v21 = vld [vmem:[%s5603_s4] sm:$0xff]  ;;  %vm846_vm1 = vcmask 261120   ;;  %v4400_v47 = vld [vmem:[%s5601_s2 + $0x8] sm:$0xff]   ;;  %v4405_v48 = vld [vmem:[%s5601_s2 + $0x10] sm:$0xff]   ;;  %vm3169_vm2 = vcmask 125952  }
   0xe   : > { %s5649_s23 = smov (!%p406_p3, %s3263_s23), 63  ;;  %3699 = vmatpush3.msra.mxu1 %v489_v20  ;;  %v3980_v34 = vld [vmem:[%s5602_s3] sm:$0xff]   ;;  %v4414_v49 = vld [vmem:[%s5601_s2 + $0x18] sm:$0xff]   ;;  %v4428_v51 = vld [vmem:[%s5601_s2 + $0x28] sm:$0xff]  }
   0xf   : > { %s3264_s26 = sshll.u32 %s5649_s23, 2  ;;  %3700 = vmatprep.subr.mxu1 %v488_v21  ;;  %v4369_v35 = vld [vmem:[%s5601_s2] sm:$0xff]   ;;  %5625 = vst [vmem:[#allocation3_spill] sm:$0xff] %v4428_v51  ;;  %v4433_v52 = vld [vmem:[%s5601_s2 + $0x30] sm:$0xff]   ;;  %v4442_v53 = vld [vmem:[%s5601_s2 + $0x38] sm:$0xff]  }
  0x10   : > { %s409_s29 = scalar_lea.vmem %s5599_s0, %s3264_s26  ;;  %3701 = vmatpush3.msra.mxu1 %v488_v21  ;;  %v3291_v39 = vld [vmem:[%s5604_s5] ss:$0 sm:$0xff]  ;;  %5626 = vst [vmem:[#allocation4_spill] sm:$0xff] %v4433_v52  ;;  %5627 = vst [vmem:[#allocation5_spill] sm:$0xff] %v4442_v53  ;;  %v4456_v55 = vld [vmem:[%s5601_s2 + $0x48] sm:$0xff]   ;;  %s5499_s25 = scalar_lea.vmem %s5611_s12, %s3264_s26 }
  0x11   : > { %v4308_v1 = vld [vmem:[%s409_s29 + $0x78] sm:$0xff]   ;;  %v4313_v3 = vld [vmem:[%s409_s29 + $0x70] sm:$0xff]   ;;  %v4319_v5 = vld [vmem:[%s409_s29 + $0x68] sm:$0xff]   ;;  %5629 = vst [vmem:[#allocation7_spill] sm:$0xff] %v4456_v55 }
  0x12   : > { %v4310_v2 = vld [vmem:[%s409_s29 + $0x38] sm:$0xff]   ;;  %3485 = vmatprep.subr.bf16.mxu0 %v4308_v1  ;;  %v4316_v4 = vld [vmem:[%s409_s29 + $0x30] sm:$0xff]   ;;  %v4322_v6 = vld [vmem:[%s409_s29 + $0x28] sm:$0xff]  }
  0x13   : > { %3486 = vmatpush3.bf16.msra.mxu0 %v4310_v2  ;;  %v4325_v7 = vld [vmem:[%s409_s29 + $0x60] sm:$0xff]   ;;  %v4329_v9 = vld [vmem:[%s409_s29 + $0x58] sm:$0xff]   ;;  %v3968_v11 = vld [vmem:[%s409_s29 + $0x50] sm:$0xff]  }
  0x14   : > { %3487 = vmatprep.subr.bf16.mxu0 %v4313_v3  ;;  %v3965_v8 = vld [vmem:[%s409_s29 + $0x20] sm:$0xff]   ;;  %v3967_v10 = vld [vmem:[%s409_s29 + $0x18] sm:$0xff]   ;;  %v3969_v12 = vld [vmem:[%s409_s29 + $0x10] sm:$0xff]  }
  0x15   : > { %v3970_v13 = vld [vmem:[%s409_s29 + $0x48] sm:$0xff]   ;;  %v3972_v15 = vld [vmem:[%s409_s29 + $0x40] sm:$0xff]   ;;  %v4461_v56 = vld [vmem:[%s5601_s2 + $0x50] sm:$0xff]  }
  0x16   : > { %v3971_v14 = vld [vmem:[%s409_s29 + $0x8] sm:$0xff]   ;;  %v3973_v16 = vld [vmem:[%s409_s29] sm:$0xff]   ;;  %5630 = vst [vmem:[#allocation8_spill] sm:$0xff] %v4461_v56  ;;  %v4470_v57 = vld [vmem:[%s5601_s2 + $0x58] sm:$0xff]  }
  0x17   : > { %3488 = vmatpush3.bf16.msra.mxu0 %v4316_v4  ;;  %v4419_v50 = vld [vmem:[%s5601_s2 + $0x20] sm:$0xff]   ;;  %5631 = vst [vmem:[#allocation9_spill] sm:$0xff] %v4470_v57  ;;  %v4484_v59 = vld [vmem:[%s5601_s2 + $0x68] sm:$0xff]   ;;  %v4489_v60 = vld [vmem:[%s5601_s2 + $0x70] sm:$0xff]  }
  0x18   : > { %3489 = vmatprep.subr.bf16.mxu0 %v4319_v5  ;;  %5624 = vst [vmem:[#allocation2_spill] sm:$0xff] %v4419_v50  ;;  %v4447_v54 = vld [vmem:[%s5601_s2 + $0x40] sm:$0xff]   ;;  %5633 = vst [vmem:[#allocation11_spill] sm:$0xff] %v4484_v59  ;;  %v4498_v61 = vld [vmem:[%s5601_s2 + $0x78] sm:$0xff]  }
  0x19   : > { %5628 = vst [vmem:[#allocation6_spill] sm:$0xff] %v4447_v54  ;;  %v4475_v58 = vld [vmem:[%s5601_s2 + $0x60] sm:$0xff]   ;;  %5634 = vst [vmem:[#allocation12_spill] sm:$0xff] %v4489_v60 }
  0x1a   : > { %5632 = vst [vmem:[#allocation10_spill] sm:$0xff] %v4475_v58  ;;  %5635 = vst [vmem:[#allocation13_spill] sm:$0xff] %v4498_v61 }
  0x1b   : > { %3490 = vmatpush3.bf16.msra.mxu0 %v4322_v6 }
  0x1c   : > { %3491 = vmatprep.subr.bf16.mxu0 %v4325_v7 }
  0x1f   : > { %3492 = vmatpush3.bf16.msra.mxu0 %v3965_v8 }
  0x20   : > { %3493 = vmatprep.subr.bf16.mxu0 %v4329_v9 }
  0x23   : > { %3494 = vmatpush3.bf16.msra.mxu0 %v3967_v10 }
  0x24   : > { %3495 = vmatprep.subr.bf16.mxu0 %v3968_v11 }
  0x27   : > { %3496 = vmatpush3.bf16.msra.mxu0 %v3969_v12 }
  0x28   : > { %3497 = vmatprep.subr.bf16.mxu0 %v3970_v13 }
  0x2b   : > { %3498 = vmatpush3.bf16.msra.mxu0 %v3971_v14 }
  0x2c   : > { %3499 = vmatprep.subr.bf16.mxu0 %v3972_v15 }
  0x2f   : > { %3500 = vmatpush3.bf16.msra.mxu0 %v3973_v16 }
  0x30   : > { %3744 = vmatprep.subr.bf16.mxu0 %v3980_v34 }
  0x32   : > { %640 = vmatmul.mubr.bf16.vlgmr.msra.gmra.mxu0 %v4335_v17 }
  0x33   : > { %647 = vmatprep.mubr.bf16.mxu0 %v4340_v18  ;;  %3745 = vmatpush3.bf16.msra.mxu0 %v3980_v34 }
  0x3a   : > { %648 = vmatmul.mubr.bf16.gmra.mxu0 %v4347_v19 }
  0x3b   : > { %3746 = vmatprep.mubr.msk.bf16.mxu0 %vm656_vm0, %v3973_v16 }
  0x42   : > { %3747 = vmatmul.mubr.msk.bf16.vlgmr.msra.gmra.mxu0 %vm656_vm0, %v3971_v14 }
  0x43   : > { %3750 = vmatprep.mubr.msk.bf16.mxu0 %vm656_vm0, %v3969_v12 }
  0x4a   : > { %3751 = vmatmul.mubr.msk.bf16.gmra.mxu0 %vm656_vm0, %v3967_v10 }
  0x4b   : > { %3754 = vmatprep.mubr.msk.bf16.mxu0 %vm656_vm0, %v3965_v8 }
  0x52   : > { %3755 = vmatmul.mubr.msk.bf16.gmra.mxu0 %vm656_vm0, %v4322_v6 }
  0x53   : > { %3758 = vmatprep.mubr.msk.bf16.mxu0 %vm656_vm0, %v4316_v4 }
  0x5a   : > { %3759 = vmatmul.mubr.msk.bf16.gmra.mxu0 %vm656_vm0, %v4310_v2 }
  0x5b   : > { %3762 = vmatprep.mubr.msk.bf16.mxu0 %vm656_vm0, %v3972_v15 }
  0x62   : > { %3763 = vmatmul.mubr.msk.bf16.gmra.mxu0 %vm656_vm0, %v3970_v13 }
  0x63   : > { %3766 = vmatprep.mubr.msk.bf16.mxu0 %vm656_vm0, %v3968_v11 }
  0x6a   : > { %3767 = vmatmul.mubr.msk.bf16.gmra.mxu0 %vm656_vm0, %v4329_v9 }
  0x6b   : > { %3770 = vmatprep.mubr.msk.bf16.mxu0 %vm656_vm0, %v4325_v7 }
  0x72   : > { %3771 = vmatmul.mubr.msk.bf16.gmra.mxu0 %vm656_vm0, %v4319_v5 }
  0x73   : > { %3774 = vmatprep.mubr.msk.bf16.mxu0 %vm656_vm0, %v4313_v3 }
  0x7a   : > { %3775 = vmatmul.mubr.msk.bf16.gmra.mxu0 %vm656_vm0, %v4308_v1 }
  0xf2   : > { %v3501_v22 = vpop.f32.mrf.mxu0 }
  0xf4   : > { %v3502_v23 = vpop.f32.mrf.mxu0 }
  0xf5   : > { %v3503_v24 = vadd.f32 %v3502_v23, %v3501_v22 }
  0xf6   : > { %v3504_v25 = vpop.f32.mrf.mxu0 }
  0xf7   : > { %3702 = vmatprep.mubr.msk.f32.mxu1 %vm656_vm0, %v3503_v24 }
  0xf8   : > { %v3505_v26 = vpop.f32.mrf.mxu0 }
  0xf9   : > { %v3506_v27 = vadd.f32 %v3505_v26, %v3504_v25 }
  0xfa   : > { %v3507_v28 = vpop.f32.mrf.mxu0 }
  0xfb   : > { %3703 = vmatmul.mubr.msk.f32.vlgmr.msra.gmra.mxu1 %vm656_vm0, %v3506_v27 }
  0xfc   : > { %v3508_v29 = vpop.f32.mrf.mxu0 }
  0xfd   : > { %v3509_v30 = vadd.f32 %v3508_v29, %v3507_v28 }
  0xfe   : > { %v3510_v31 = vpop.f32.mrf.mxu0 }
  0xff   : > { %3705 = vmatprep.mubr.msk.f32.mxu1 %vm656_vm0, %v3509_v30 }
 0x100   : > { %v3511_v32 = vpop.f32.mrf.mxu0 }
 0x101   : > { %v3512_v33 = vadd.f32 %v3511_v32, %v3510_v31 }
 0x102   : > { %v4503_v62 = vpop.f32.mrf.mxu0 }
 0x103   : > { %3706 = vmatmul.mubr.msk.f32.gmra.mxu1 %vm656_vm0, %v3512_v33 }
 0x104   : > { %3712 = vmatprep.mubr.msk.bf16.mxu1 %vm846_vm1, %v4369_v35  ;;  %v4505_v63 = vpop.f32.mrf.mxu0 }
 0x106   : > { %v4507_v1 = vpop.f32.mrf.mxu0 }
 0x108   : > { %v4509_v2 = vpop.f32.mrf.mxu0 }
 0x10a   : > { %v3752_v3 = vpop.f32.mrf.mxu0 }
 0x10c   : > { %v4511_v4 = vpop.f32.mrf.mxu0 }
 0x10e   : > { %v4513_v5 = vpop.f32.mrf.mxu0 }
 0x110   : > { %v4515_v6 = vpop.f32.mrf.mxu0 }
 0x112   : > { %v3756_v7 = vpop.f32.mrf.mxu0 }
 0x114   : > { %v1176_v8 = vpop.f32.mrf.mxu0 }
 0x116   : > { %v3757_v9 = vpop.f32.mrf.mxu0 }
 0x118   : > { %v1179_v10 = vpop.f32.mrf.mxu0 }
 0x1bb   : > { %v3704_v36 = vpop.f32.mrf.mxu1 }
 0x1bc   : > { %v761_v44 = vsub.f32 %v3291_v39, %v3704_v36 }
 0x1bd   : > { %v735_v37 = vpop.f32.mrf.mxu1 }
 0x1be   : > { %v760_v41 = vsub.f32 %v3291_v39, %v735_v37 }
 0x1c0   : > { %v764_v46 = vpack.c.bf16 %v761_v44, %v760_v41 }
 0x1c3   : > { %v3707_v38 = vpop.f32.mrf.mxu1 }
 0x1c4   : > { %v763_v42 = vsub.f32 %v3291_v39, %v3707_v38 }
 0x1c5   : > { %v745_v40 = vpop.f32.mrf.mxu1 }
 0x1c6   : > { %v762_v43 = vsub.f32 %v3291_v39, %v745_v40 }
 0x1c8   : > { %v765_v45 = vpack.c.bf16 %v763_v42, %v762_v43 }
 0x1ca   : > { %3708 = vmatprep.subr.bf16.mxu1 %v765_v45 }
 0x1cb   : > { %3709 = vmatpush3.bf16.msra.mxu1 %v765_v45 }
 0x1cc   : > { %3710 = vmatprep.subr.bf16.mxu1 %v764_v46 }
 0x1cf   : > { %3711 = vmatpush3.bf16.msra.mxu1 %v764_v46 }
 0x1d2   : > { %3713 = vmatmul.mubr.msk.bf16.vlgmr.msra.gmra.mxu1 %vm846_vm1, %v4400_v47 }
 0x1d3   : > { %3716 = vmatprep.mubr.msk.bf16.mxu1 %vm846_vm1, %v4405_v48 }
 0x1da   : > { %3717 = vmatmul.mubr.msk.bf16.gmra.mxu1 %vm846_vm1, %v4414_v49 }
 0x1db   : > { %3720 = vmatprep.mubr.msk.bf16.mxu1 %vm846_vm1, %v4419_v50 }
 0x1e2   : > { %3721 = vmatmul.mubr.msk.bf16.gmra.mxu1 %vm846_vm1, %v4428_v51 }
 0x1e3   : > { %3724 = vmatprep.mubr.msk.bf16.mxu1 %vm846_vm1, %v4433_v52 }
 0x1ea   : > { %3725 = vmatmul.mubr.msk.bf16.gmra.mxu1 %vm846_vm1, %v4442_v53 }
 0x1eb   : > { %3728 = vmatprep.mubr.msk.bf16.mxu1 %vm846_vm1, %v4447_v54 }
 0x1f2   : > { %3729 = vmatmul.mubr.msk.bf16.gmra.mxu1 %vm846_vm1, %v4456_v55 }
 0x1f3   : > { %3732 = vmatprep.mubr.msk.bf16.mxu1 %vm846_vm1, %v4461_v56 }
 0x1fa   : > { %3733 = vmatmul.mubr.msk.bf16.gmra.mxu1 %vm846_vm1, %v4470_v57 }
 0x1fb   : > { %3736 = vmatprep.mubr.msk.bf16.mxu1 %vm846_vm1, %v4475_v58 }
 0x202   : > { %3737 = vmatmul.mubr.msk.bf16.gmra.mxu1 %vm846_vm1, %v4484_v59 }
 0x203   : > { %3740 = vmatprep.mubr.msk.bf16.mxu1 %vm846_vm1, %v4489_v60 }
 0x20a   : > { %3741 = vmatmul.mubr.msk.bf16.gmra.mxu1 %vm846_vm1, %v4498_v61 }
 0x20b   : > { %1552 = vmatprep.mubr.bf16.mxu1 %v4297_v0  ;;  %v3760_v0 = vpop.f32.mrf.mxu0 }
 0x20d   : > { %v1192_v11 = vpop.f32.mrf.mxu0 }
 0x20f   : > { %v3761_v12 = vpop.f32.mrf.mxu0 }
 0x211   : > { %v1195_v13 = vpop.f32.mrf.mxu0 }
 0x213   : > { %v4521_v16 = vpop.f32.mrf.mxu0 }
 0x215   : > { %v4527_v22 = vpop.f32.mrf.mxu0 }
 0x217   : > { %v4533_v26 = vpop.f32.mrf.mxu0 }
 0x219   : > { %v4539_v29 = vpop.f32.mrf.mxu0 }
 0x21b   : > { %v4543_v33 = vpop.f32.mrf.mxu0 }
 0x21d   : > { %v4554_v42 = vpop.f32.mrf.mxu0 }
 0x292   : > { %v4517_v14 = vpop.f32.mrf.mxu1 }
 0x294   : > { %v4519_v15 = vpop.f32.mrf.mxu1 }
 0x296   : > { %v4523_v20 = vpop.f32.mrf.mxu1 }
 0x298   : > { %v4525_v21 = vpop.f32.mrf.mxu1 }
 0x29a   : > { %v3718_v23 = vpop.f32.mrf.mxu1 }
 0x29b   : > { %v4529_v24 = vadd.f32 %v3752_v3, %v3718_v23  ;;  %v3769_v23 = vpop.f32.mrf.mxu0 }
 0x29c   : > { %v4531_v25 = vpop.f32.mrf.mxu1 }
 0x29e   : > { %v4535_v27 = vpop.f32.mrf.mxu1 }
 0x2a0   : > { %v4537_v28 = vpop.f32.mrf.mxu1 }
 0x2a2   : > { %v3722_v30 = vpop.f32.mrf.mxu1 }
 0x2a3   : > { %v4541_v31 = vadd.f32 %v3756_v7, %v3722_v30 }
 0x2a4   : > { %v961_v32 = vpop.f32.mrf.mxu1 }
 0x2a5   : > { %v4545_v34 = vadd.f32 %v1176_v8, %v961_v32  ;;  %v1281_v36 = vmul.f32 %v4541_v31, %v4541_v31 }
 0x2a6   : > { %v3723_v37 = vpop.f32.mrf.mxu1 }
 0x2a7   : > { %v4549_v38 = vadd.f32 %v3757_v9, %v3723_v37  ;;  %v1333_v39 = vsel %vm846_vm1, %v1281_v36, 0.0  ;;  %v1279_v40 = vmul.f32 %v4545_v34, %v4545_v34 }
 0x2a8   : > { %1334 = vadd.xlane.f32.xlu0 %v1333_v39  ;;  %v964_v41 = vpop.f32.mrf.mxu1 }
 0x2a9   : > { %v4556_v43 = vadd.f32 %v1179_v10, %v964_v41  ;;  %v1282_v44 = vmul.f32 %v4549_v38, %v4549_v38  ;;  %v1327_v3 = vsel %vm846_vm1, %v1279_v40, 0.0  ;;  %v4575_v40 = vpop.f32.mrf.mxu0 }
 0x2aa   : > { %v3726_v45 = vpop.f32.mrf.mxu1 }
 0x2ab   : > { %v4560_v46 = vadd.f32 %v3760_v0, %v3726_v45  ;;  %v1336_v7 = vsel %vm846_vm1, %v1282_v44, 0.0  ;;  %v1280_v8 = vmul.f32 %v4556_v43, %v4556_v43 }
 0x2ac   : > { %1328 = vadd.xlane.f32.xlu0 %v1327_v3  ;;  %1337 = vadd.xlane.f32.xlu1 %v1336_v7  ;;  %v977_v9 = vpop.f32.mrf.mxu1  ;;  %v3772_v7 = vpop.f32.mrf.mxu0 }
 0x2ad   : > { %v4566_v30 = vadd.f32 %v1192_v11, %v977_v9  ;;  %v1330_v36 = vsel %vm846_vm1, %v1280_v8, 0.0  ;;  %v1285_v37 = vmul.f32 %v4560_v46, %v4560_v46 }
 0x2ae   : > { %v3727_v10 = vpop.f32.mrf.mxu1 }
 0x2af   : > { %v4568_v32 = vadd.f32 %v3761_v12, %v3727_v10  ;;  %v1283_v0 = vmul.f32 %v4566_v30, %v4566_v30  ;;  %v1345_v12 = vsel %vm846_vm1, %v1285_v37, 0.0 }
 0x2b0   : > { %1331 = vadd.xlane.f32.xlu1 %v1330_v36  ;;  %v980_v39 = vpop.f32.mrf.mxu1 }
 0x2b1   : > { %v1339_v41 = vsel %vm846_vm1, %v1283_v0, 0.0  ;;  %v4580_v44 = vadd.f32 %v1195_v13, %v980_v39  ;;  %v1286_v45 = vmul.f32 %v4568_v32, %v4568_v32  ;;  %v1240_v13 = vpop.f32.mrf.mxu0 }
 0x2b2   : > { %1340 = vadd.xlane.f32.xlu0 %v1339_v41  ;;  %v4578_v11 = vpop.f32.mrf.mxu1 }
 0x2b3   : > { %v1348_v9 = vsel %vm846_vm1, %v1286_v45, 0.0  ;;  %v1284_v10 = vmul.f32 %v4580_v44, %v4580_v44  ;;  %v3773_v41 = vpop.f32.mrf.mxu0 }
 0x2b4   : > { %1346 = vadd.xlane.f32.xlu1 %v1345_v12  ;;  %v4585_v3 = vpop.f32.mrf.mxu1 }
 0x2b5   : > { %v1342_v37 = vsel %vm846_vm1, %v1284_v10, 0.0  ;;  %v1243_v60 = vpop.f32.mrf.mxu0 }
 0x2b6   : > { %v4587_v8 = vpop.f32.mrf.mxu1 }
 0x2b7   : > { %v3776_v57 = vpop.f32.mrf.mxu0 }
 0x2b8   : > { %1349 = vadd.xlane.f32.xlu1 %v1348_v9  ;;  %v4592_v36 = vpop.f32.mrf.mxu1 }
 0x2b9   : > { %v1256_v53 = vpop.f32.mrf.mxu0 }
 0x2ba   : > { %v3734_v0 = vpop.f32.mrf.mxu1 }
 0x2bb   : > { %v3777_v50 = vpop.f32.mrf.mxu0 }
 0x2bc   : > { %1343 = vadd.xlane.f32.xlu1 %v1342_v37  ;;  %v1009_v39 = vpop.f32.mrf.mxu1 }
 0x2be   : > { %v3735_v12 = vpop.f32.mrf.mxu1 }
 0x2c0   : > { %v1012_v61 = vpop.f32.mrf.mxu1 }
 0x2c2   : > { %v3738_v59 = vpop.f32.mrf.mxu1 }
 0x2c3   : > { %v4595_v58 = vadd.f32 %v3772_v7, %v3738_v59 }
 0x2c4   : > { %v1025_v45 = vpop.f32.mrf.mxu1 }
 0x2c5   : > { %v4597_v56 = vadd.f32 %v1240_v13, %v1025_v45  ;;  %v1297_v9 = vmul.f32 %v4595_v58, %v4595_v58  ;;  %v4610_v13 = vadd.f32 %v3769_v23, %v3735_v12 }
 0x2c6   : > { %v3739_v55 = vpop.f32.mrf.mxu1 }
 0x2c7   : > { %v4601_v54 = vadd.f32 %v3773_v41, %v3739_v55  ;;  %v1381_v10 = vsel %vm846_vm1, %v1297_v9, 0.0  ;;  %v1295_v37 = vmul.f32 %v4597_v56, %v4597_v56 }
 0x2c8   : > { %1382 = vadd.xlane.f32.xlu0 %v1381_v10  ;;  %v1028_v52 = vpop.f32.mrf.mxu1 }
 0x2c9   : > { %v4606_v59 = vadd.f32 %v1243_v60, %v1028_v52  ;;  %v1298_v7 = vmul.f32 %v4601_v54, %v4601_v54  ;;  %v1375_v55 = vsel %vm846_vm1, %v1295_v37, 0.0 }
 0x2ca   : > { %v3742_v45 = vpop.f32.mrf.mxu1 }
 0x2cb   : > { %v4612_v51 = vadd.f32 %v3776_v57, %v3742_v45  ;;  %v1384_v41 = vsel %vm846_vm1, %v1298_v7, 0.0  ;;  %v1296_v9 = vmul.f32 %v4606_v59, %v4606_v59  ;;  %v1294_v57 = vmul.f32 %v4610_v13, %v4610_v13 }
 0x2cc   : > { %1376 = vadd.xlane.f32.xlu0 %v1375_v55  ;;  %1385 = vadd.xlane.f32.xlu1 %v1384_v41  ;;  %v1041_v52 = vpop.f32.mrf.mxu1  ;;  %v1259_v55 = vpop.f32.mrf.mxu0 }
 0x2cd   : > { %v4618_v60 = vadd.f32 %v1256_v53, %v1041_v52  ;;  %v1301_v23 = vmul.f32 %v4612_v51, %v4612_v51  ;;  %v1378_v37 = vsel %vm846_vm1, %v1296_v9, 0.0  ;;  %v4634_v52 = vadd.f32 %v4513_v5, %v4535_v27 }
 0x2ce   : > { %v3743_v12 = vpop.f32.mrf.mxu1  ;;  %v1372_v9 = vsel %vm846_vm1, %v1294_v57, 0.0  ;;  %v4648_v5 = vadd.f32 %v4575_v40, %v1012_v61  ;;  %v4656_v57 = vadd.f32 %v4515_v6, %v4537_v28  ;;  %v4674_v28 = vadd.f32 %v4533_v26, %v4587_v8 }
 0x2cf   : > { %v4624_v10 = vadd.f32 %v3777_v50, %v3743_v12  ;;  %v1393_v7 = vsel %vm846_vm1, %v1301_v23, 0.0  ;;  %v1299_v45 = vmul.f32 %v4618_v60, %v4618_v60  ;;  %v4637_v50 = vadd.f32 %v4543_v33, %v3734_v0 }
 0x2d0   : > { %1379 = vadd.xlane.f32.xlu1 %v1378_v37  ;;  %1394 = vadd.xlane.f32.xlu0 %v1393_v7  ;;  %v1044_v53 = vpop.f32.mrf.mxu1  ;;  %v1278_v7 = vmul.f32 %v4634_v52, %v4634_v52  ;;  %v4689_v26 = vadd.f32 %v4521_v16, %v4578_v11  ;;  %v4703_v16 = vadd.f32 %v4539_v29, %v4592_v36 }
 0x2d1   : > { %v4630_v41 = vadd.f32 %v1259_v55, %v1044_v53  ;;  %v1387_v23 = vsel %vm846_vm1, %v1299_v45, 0.0  ;;  %v1302_v12 = vmul.f32 %v4624_v10, %v4624_v10  ;;  %v1293_v0 = vmul.f32 %v4637_v50, %v4637_v50 }
 0x2d2   : > { %v1277_v45 = vmul.f32 %v4529_v24, %v4529_v24  ;;  %v4661_v55 = vadd.f32 %v4554_v42, %v1009_v39  ;;  %v1324_v40 = vsel %vm846_vm1, %v1278_v7, 0.0  ;;  %v1292_v53 = vmul.f32 %v4648_v5, %v4648_v5 }
 0x2d3   : > { %v1300_v37 = vmul.f32 %v4630_v41, %v4630_v41  ;;  %v1396_v27 = vsel %vm846_vm1, %v1302_v12, 0.0  ;;  %v1369_v61 = vsel %vm846_vm1, %v1293_v0, 0.0  ;;  %v4717_v29 = vadd.f32 %v4527_v22, %v4585_v3 }
 0x2d4   : > { %1373 = vadd.xlane.f32.xlu1 %v1372_v9  ;;  %1388 = vadd.xlane.f32.xlu0 %v1387_v23  ;;  %v4669_v9 = vadd.f32 %v4511_v4, %v4531_v25  ;;  %v1321_v6 = vsel %vm846_vm1, %v1277_v45, 0.0  ;;  %v1366_v42 = vsel %vm846_vm1, %v1292_v53, 0.0  ;;  %v1291_v39 = vmul.f32 %v4661_v55, %v4661_v55  ;;  %v3997_v53 = vld [vmem:[%s5605_s6 + $0x8] sm:$0xff]  }
 0x2d5   : > { %v1390_v33 = vsel %vm846_vm1, %v1300_v37, 0.0  ;;  %v1276_v23 = vmul.f32 %v4656_v57, %v4656_v57  ;;  %v4683_v4 = vadd.f32 %v4507_v1, %v4523_v20  ;;  %v1290_v37 = vmul.f32 %v4674_v28, %v4674_v28  ;;  %3828 = vmatprep.subr.bf16.mxu0 %v3997_v53 }
 0x2d6   : > { %v1275_v25 = vmul.f32 %v4669_v9, %v4669_v9  ;;  %v1363_v8 = vsel %vm846_vm1, %v1291_v39, 0.0  ;;  %v4697_v1 = vadd.f32 %v4503_v62, %v4517_v14  ;;  %v4711_v62 = vadd.f32 %v4509_v2, %v4525_v21  ;;  %3829 = vmatpush3.bf16.msra.mxu0 %v3997_v53 }
 0x2d7   : > { %v1318_v12 = vsel %vm846_vm1, %v1276_v23, 0.0  ;;  %v1274_v20 = vmul.f32 %v4683_v4, %v4683_v4  ;;  %v1360_v7 = vsel %vm846_vm1, %v1290_v37, 0.0  ;;  %v1288_v0 = vmul.f32 %v4703_v16, %v4703_v16 }
 0x2d8   : > { %1397 = vadd.xlane.f32.xlu0 %v1396_v27  ;;  %1391 = vadd.xlane.f32.xlu1 %v1390_v33  ;;  %v1315_v11 = vsel %vm846_vm1, %v1275_v25, 0.0  ;;  %v1289_v27 = vmul.f32 %v4689_v26, %v4689_v26  ;;  %v1273_v14 = vmul.f32 %v4697_v1, %v4697_v1  ;;  %v4725_v2 = vadd.f32 %v4505_v63, %v4519_v15 }
 0x2d9   : > { %v1312_v33 = vsel %vm846_vm1, %v1274_v20, 0.0  ;;  %v1354_v45 = vsel %vm846_vm1, %v1288_v0, 0.0  ;;  %v1287_v22 = vmul.f32 %v4717_v29, %v4717_v29  ;;  %v1272_v3 = vmul.f32 %v4711_v62, %v4711_v62 }
 0x2da   : > { %v1357_v36 = vsel %vm846_vm1, %v1289_v27, 0.0  ;;  %v1309_v21 = vsel %vm846_vm1, %v1273_v14, 0.0  ;;  %v1271_v63 = vmul.f32 %v4725_v2, %v4725_v2 }
 0x2dc   : > { %1370 = vadd.xlane.f32.xlu0 %v1369_v61  ;;  %1325 = vadd.xlane.f32.xlu1 %v1324_v40  ;;  %v1351_v61 = vsel %vm846_vm1, %v1287_v22, 0.0  ;;  %v1306_v40 = vsel %vm846_vm1, %v1272_v3, 0.0  ;;  %v1303_v15 = vsel %vm846_vm1, %v1271_v63, 0.0 }
 0x2e0   : > { %1322 = vadd.xlane.f32.xlu0 %v1321_v6  ;;  %1367 = vadd.xlane.f32.xlu1 %v1366_v42  ;;  %v3998_v6 = vld [vmem:[%s5605_s6] sm:$0xff]  }
 0x2e1   : > { %3830 = vmatprep.subr.bf16.mxu0 %v3998_v6 }
 0x2e2   : > { %3831 = vmatpush3.bf16.msra.mxu0 %v3998_v6 }
 0x2e4   : > { %1364 = vadd.xlane.f32.xlu0 %v1363_v8  ;;  %1319 = vadd.xlane.f32.xlu1 %v1318_v12 }
 0x2e8   : > { %1316 = vadd.xlane.f32.xlu0 %v1315_v11  ;;  %1361 = vadd.xlane.f32.xlu1 %v1360_v7 }
 0x2ec   : > { %1358 = vadd.xlane.f32.xlu0 %v1357_v36  ;;  %1313 = vadd.xlane.f32.xlu1 %v1312_v33 }
 0x2f0   : > { %1310 = vadd.xlane.f32.xlu0 %v1309_v21  ;;  %1355 = vadd.xlane.f32.xlu1 %v1354_v45 }
 0x2f4   : > { %1352 = vadd.xlane.f32.xlu0 %v1351_v61  ;;  %1307 = vadd.xlane.f32.xlu1 %v1306_v40 }
 0x2f8   : > { %1304 = vadd.xlane.f32.xlu0 %v1303_v15 }
 0x331   : > { %v1335_v23 = vpop.xlane.xlu0 %1334 }
 0x335   : > { %v1338_v42 = vpop.xlane.xlu1 %1337  ;;  %v1329_v8 = vpop.xlane.xlu0 %1328 }
 0x339   : > { %v1332_v39 = vpop.xlane.xlu1 %1331 }
 0x33b   : > { %v1341_v37 = vpop.xlane.xlu0 %1340 }
 0x33c   : > { %4001 = vrsqrt.f32 %v1341_v37 }
 0x33d   : > { %v1347_v25 = vpop.xlane.xlu1 %1346 }
 0x33e   : > { %4003 = vrsqrt.f32 %v1347_v25 }
 0x341   : > { %v1350_v12 = vpop.xlane.xlu1 %1349 }
 0x342   : > { %4005 = vrsqrt.f32 %v1350_v12 }
 0x345   : > { %v1344_v20 = vpop.xlane.xlu1 %1343 }
 0x349   : > { %v4002_v61 = vpop.eup %4001 }
 0x34b   : > { %v4004_v40 = vpop.eup %4003 }
 0x34f   : > { %v4006_v53 = vpop.eup %4005 }
 0x351   : > { %v1383_v11 = vpop.xlane.xlu0 %1382 }
 0x355   : > { %v1377_v7 = vpop.xlane.xlu0 %1376  ;;  %v1386_v27 = vpop.xlane.xlu1 %1385 }
 0x359   : > { %v1380_v14 = vpop.xlane.xlu1 %1379  ;;  %v1395_v36 = vpop.xlane.xlu0 %1394 }
 0x35a   : > { %4007 = vrsqrt.f32 %v1395_v36 }
 0x35b   : > { %4009 = vrsqrt.f32 %v1344_v20  ;;  %v1446_v20 = vmul.f32 %v4006_v53, %v4568_v32 }
 0x35d   : > { %v1374_v33 = vpop.xlane.xlu1 %1373  ;;  %v1389_v0 = vpop.xlane.xlu0 %1388 }
 0x35e   : > { %4011 = vrsqrt.f32 %v1389_v0 }
 0x35f   : > { %4013 = vrsqrt.f32 %v1386_v27 }
 0x361   : > { %v1398_v21 = vpop.xlane.xlu0 %1397  ;;  %v1392_v45 = vpop.xlane.xlu1 %1391 }
 0x362   : > { %4015 = vrsqrt.f32 %v1398_v21  ;;  %v1478_v21 = vmax.f32 %v1446_v20, 0.0 }
 0x363   : > { %4017 = vrsqrt.f32 %v1392_v45 }
 0x364   : > { %4019 = vrsqrt.f32 %v1383_v11 }
 0x365   : > { %4021 = vrsqrt.f32 %v1338_v42  ;;  %v1371_v22 = vpop.xlane.xlu0 %1370  ;;  %v1326_v3 = vpop.xlane.xlu1 %1325 }
 0x366   : > { %4023 = vrsqrt.f32 %v1380_v14 }
 0x367   : > { %4025 = vrsqrt.f32 %v1335_v23  ;;  %v4008_v6 = vpop.eup %4007 }
 0x368   : > { %4027 = vrsqrt.f32 %v1377_v7  ;;  %v4010_v25 = vpop.eup %4009  ;;  %v1461_v23 = vmul.f32 %v4008_v6, %v4612_v51 }
 0x369   : > { %4029 = vrsqrt.f32 %v1332_v39  ;;  %v1323_v63 = vpop.xlane.xlu0 %1322  ;;  %v1368_v15 = vpop.xlane.xlu1 %1367  ;;  %v1445_v39 = vmul.f32 %v4004_v40, %v4560_v46  ;;  %v1444_v45 = vmul.f32 %v4010_v25, %v4580_v44 }
 0x36a   : > { %4031 = vrsqrt.f32 %v1371_v22  ;;  %v1493_v51 = vmax.f32 %v1461_v23, 0.0 }
 0x36b   : > { %4033 = vrsqrt.f32 %v1329_v8  ;;  %v4012_v12 = vpop.eup %4011  ;;  %v1476_v20 = vmax.f32 %v1444_v45, 0.0 }
 0x36c   : > { %4035 = vrsqrt.f32 %v1374_v33  ;;  %v4014_v11 = vpop.eup %4013  ;;  %v1459_v14 = vmul.f32 %v4012_v12, %v4618_v60  ;;  %v1443_v60 = vmul.f32 %v4002_v61, %v4566_v30 }
 0x36d   : > { %4037 = vrsqrt.f32 %v1323_v63  ;;  %v1365_v37 = vpop.xlane.xlu0 %1364  ;;  %v1320_v42 = vpop.xlane.xlu1 %1319  ;;  %v1458_v46 = vmul.f32 %v4014_v11, %v4601_v54  ;;  %v1477_v63 = vmax.f32 %v1445_v39, 0.0 }
 0x36e   : > { %4039 = vrsqrt.f32 %v1365_v37  ;;  %v1491_v6 = vmax.f32 %v1459_v14, 0.0 }
 0x36f   : > { %v4016_v7 = vpop.eup %4015  ;;  %4041 = vrsqrt.f32 %v1326_v3  ;;  %v4756_v37 = vpack.c.bf16 %v1478_v21, %v1477_v63  ;;  %v1490_v61 = vmax.f32 %v1458_v46, 0.0 }
 0x370   : > { %v4018_v27 = vpop.eup %4017  ;;  %4043 = vrsqrt.f32 %v1368_v15  ;;  %v1462_v8 = vmul.f32 %v4016_v7, %v4624_v10 }
 0x371   : > { %v4020_v36 = vpop.eup %4019  ;;  %v1317_v33 = vpop.xlane.xlu0 %1316  ;;  %v1460_v32 = vmul.f32 %v4018_v27, %v4630_v41 }
 0x372   : > { %v1362_v0 = vpop.xlane.xlu1 %1361  ;;  %v4022_v22 = vpop.eup %4021  ;;  %4045 = vrsqrt.f32 %v1317_v33  ;;  %v1494_v3 = vmax.f32 %v1462_v8, 0.0  ;;  %v1457_v41 = vmul.f32 %v4020_v36, %v4595_v58  ;;  %v1475_v58 = vmax.f32 %v1443_v60, 0.0 }
 0x373   : > { %v4024_v40 = vpop.eup %4023  ;;  %4047 = vrsqrt.f32 %v1320_v42  ;;  %v1492_v10 = vmax.f32 %v1460_v32, 0.0  ;;  %v1442_v54 = vmul.f32 %v4022_v22, %v4549_v38 }
 0x374   : > { %v4026_v15 = vpop.eup %4025  ;;  %4049 = vrsqrt.f32 %v1362_v0  ;;  %v4753_v53 = vpack.c.bf16 %v1494_v3, %v1493_v51  ;;  %v1456_v11 = vmul.f32 %v4024_v40, %v4606_v59  ;;  %v1489_v38 = vmax.f32 %v1457_v41, 0.0 }
 0x375   : > { %v4028_v44 = vpop.eup %4027  ;;  %v1359_v25 = vpop.xlane.xlu0 %1358  ;;  %v4760_v30 = vpack.c.bf16 %v1492_v10, %v1491_v6  ;;  %v1441_v7 = vmul.f32 %v4026_v15, %v4541_v31  ;;  %v4767_v33 = vpack.c.bf16 %v1476_v20, %v1475_v58  ;;  %v1474_v0 = vmax.f32 %v1442_v54, 0.0 }
 0x376   : > { %v1314_v12 = vpop.xlane.xlu1 %1313  ;;  %v4030_v42 = vpop.eup %4029  ;;  %4051 = vrsqrt.f32 %v1359_v25  ;;  %3554 = vmatprep.subr.bf16.mxu1 %v4753_v53  ;;  %v1455_v27 = vmul.f32 %v4028_v44, %v4597_v56  ;;  %v4770_v32 = vpack.c.bf16 %v1490_v61, %v1489_v38  ;;  %v1488_v45 = vmax.f32 %v1456_v11, 0.0 }
 0x377   : > { %v4032_v23 = vpop.eup %4031  ;;  %4053 = vrsqrt.f32 %v1314_v12  ;;  %3555 = vmatpush3.bf16.msra.mxu1 %v4756_v37  ;;  %v1440_v59 = vmul.f32 %v4030_v42, %v4556_v43  ;;  %v1473_v56 = vmax.f32 %v1441_v7, 0.0 }
 0x378   : > { %v4034_v39 = vpop.eup %4033  ;;  %3556 = vmatprep.subr.bf16.mxu1 %v4760_v30  ;;  %v1453_v31 = vmul.f32 %v4032_v23, %v4637_v50  ;;  %v1487_v46 = vmax.f32 %v1455_v27, 0.0 }
 0x379   : > { %v4036_v8 = vpop.eup %4035  ;;  %v1311_v14 = vpop.xlane.xlu0 %1310  ;;  %v1439_v51 = vmul.f32 %v4034_v39, %v4545_v34  ;;  %v4777_v60 = vpack.c.bf16 %v1474_v0, %v1473_v56  ;;  %v1472_v15 = vmax.f32 %v1440_v59, 0.0 }
 0x37a   : > { %v1356_v36 = vpop.xlane.xlu1 %1355  ;;  %v4038_v21 = vpop.eup %4037  ;;  %4055 = vrsqrt.f32 %v1311_v14  ;;  %v1454_v43 = vmul.f32 %v4036_v8, %v4610_v13  ;;  %v4780_v6 = vpack.c.bf16 %v1488_v45, %v1487_v46  ;;  %v1485_v41 = vmax.f32 %v1453_v31, 0.0 }
 0x37b   : > { %v4040_v22 = vpop.eup %4039  ;;  %4057 = vrsqrt.f32 %v1356_v36  ;;  %3557 = vmatpush3.bf16.msra.mxu1 %v4767_v33  ;;  %v1437_v50 = vmul.f32 %v4038_v21, %v4529_v24  ;;  %v1471_v25 = vmax.f32 %v1439_v51, 0.0 }
 0x37c   : > { %v4042_v3 = vpop.eup %4041  ;;  %3558 = vmatprep.subr.bf16.mxu1 %v4770_v32  ;;  %v1451_v34 = vmul.f32 %v4040_v22, %v4661_v55  ;;  %v1486_v20 = vmax.f32 %v1454_v43, 0.0 }
 0x37d   : > { %v4044_v40 = vpop.eup %4043  ;;  %v1353_v63 = vpop.xlane.xlu0 %1352  ;;  %v1438_v13 = vmul.f32 %v4042_v3, %v4634_v52  ;;  %v1499_v61 = vpack.c.bf16 %v1472_v15, %v1471_v25  ;;  %v1469_v11 = vmax.f32 %v1437_v50, 0.0 }
 0x37e   : > { %v1308_v10 = vpop.xlane.xlu1 %1307  ;;  %4059 = vrsqrt.f32 %v1353_v63  ;;  %v1452_v54 = vmul.f32 %v4044_v40, %v4648_v5  ;;  %v1506_v55 = vpack.c.bf16 %v1486_v20, %v1485_v41  ;;  %v1483_v58 = vmax.f32 %v1451_v34, 0.0 }
 0x37f   : > { %v4046_v44 = vpop.eup %4045  ;;  %4061 = vrsqrt.f32 %v1308_v10  ;;  %3559 = vmatpush3.bf16.msra.mxu1 %v4777_v60  ;;  %v1470_v39 = vmax.f32 %v1438_v13, 0.0 }
 0x380   : > { %v4048_v12 = vpop.eup %4047  ;;  %3560 = vmatprep.subr.bf16.mxu1 %v4780_v6  ;;  %v1435_v23 = vmul.f32 %v4046_v44, %v4669_v9  ;;  %v1484_v27 = vmax.f32 %v1452_v54, 0.0 }
 0x381   : > { %v4050_v24 = vpop.eup %4049  ;;  %v1305_v42 = vpop.xlane.xlu0 %1304  ;;  %v1436_v52 = vmul.f32 %v4048_v12, %v4656_v57  ;;  %v1498_v14 = vpack.c.bf16 %v1470_v39, %v1469_v11 }
 0x382   : > { %4063 = vrsqrt.f32 %v1305_v42  ;;  %v1450_v5 = vmul.f32 %v4050_v24, %v4674_v28  ;;  %v1467_v36 = vmax.f32 %v1435_v23, 0.0  ;;  %v1505_v0 = vpack.c.bf16 %v1484_v27, %v1483_v58  ;;  %v3345_v42 = vld [vmem:[%s5607_s8] ss:$0 sm:$0xff]  ;;  %v5639_v27 = vld [vmem:[#allocation5_spill] sm:$0xff] }
 0x383   : > { %v4052_v7 = vpop.eup %4051  ;;  %3561 = vmatpush3.bf16.msra.mxu1 %v1499_v61  ;;  %v1468_v45 = vmax.f32 %v1436_v52, 0.0  ;;  %v5637_v52 = vld [vmem:[#allocation3_spill] sm:$0xff] }
 0x384   : > { %v4054_v38 = vpop.eup %4053  ;;  %3562 = vmatprep.subr.bf16.mxu1 %v1506_v55  ;;  %v1449_v8 = vmul.f32 %v4052_v7, %v4689_v26  ;;  %v1482_v22 = vmax.f32 %v1450_v5, 0.0  ;;  %v5644_v5 = vld [vmem:[#allocation10_spill] sm:$0xff] }
 0x385   : > { %v1434_v9 = vmul.f32 %v4054_v38, %v4683_v4  ;;  %v1497_v56 = vpack.c.bf16 %v1468_v45, %v1467_v36  ;;  %v5638_v38 = vld [vmem:[#allocation4_spill] sm:$0xff] }
 0x386   : > { %v1481_v59 = vmax.f32 %v1449_v8, 0.0  ;;  %v5640_v8 = vld [vmem:[#allocation6_spill] sm:$0xff]  ;;  %v5646_v36 = vld [vmem:[#allocation12_spill] sm:$0xff] }
 0x387   : > { %v4056_v21 = vpop.eup %4055  ;;  %3563 = vmatpush3.bf16.msra.mxu1 %v1498_v14  ;;  %v1466_v26 = vmax.f32 %v1434_v9, 0.0 }
 0x388   : > { %v4058_v31 = vpop.eup %4057  ;;  %3564 = vmatprep.subr.bf16.mxu1 %v1505_v0  ;;  %v1433_v57 = vmul.f32 %v4056_v21, %v4697_v1  ;;  %v1504_v51 = vpack.c.bf16 %v1482_v22, %v1481_v59  ;;  %v4193_v59 = vld [vmem:[%s5600_s1 + $0x4] ss:$8 sps:$4 sm:$0xff]  }
 0x389   : > { %v1448_v28 = vmul.f32 %v4058_v31, %v4703_v16 }
 0x38a   : > { %v1465_v3 = vmax.f32 %v1433_v57, 0.0 }
 0x38b   : > { %v4060_v46 = vpop.eup %4059  ;;  %3565 = vmatpush3.bf16.msra.mxu1 %v1497_v56  ;;  %v1480_v10 = vmax.f32 %v1448_v28, 0.0 }
 0x38c   : > { %v4062_v43 = vpop.eup %4061  ;;  %3566 = vmatprep.subr.bf16.mxu1 %v1504_v51  ;;  %v1496_v40 = vpack.c.bf16 %v1466_v26, %v1465_v3  ;;  %v1447_v4 = vmul.f32 %v4060_v46, %v4717_v29 }
 0x38d   : > { %v1432_v15 = vmul.f32 %v4062_v43, %v4711_v62  ;;  %v1515_v62 = vld [vmem:[%s5606_s7] sm:$0xff] }
 0x38e   : > { %v1479_v63 = vmax.f32 %v1447_v4, 0.0 }
 0x38f   : > { %v4064_v50 = vpop.eup %4063  ;;  %3567 = vmatpush3.bf16.msra.mxu1 %v1496_v40  ;;  %v1464_v44 = vmax.f32 %v1432_v15, 0.0 }
 0x390   : > { %v1503_v1 = vpack.c.bf16 %v1480_v10, %v1479_v63  ;;  %v1431_v41 = vmul.f32 %v4064_v50, %v4725_v2 }
 0x392   : > { %3568 = vmatprep.subr.bf16.mxu1 %v1503_v1  ;;  %v1463_v34 = vmax.f32 %v1431_v41, 0.0 }
 0x394   : > { %v1495_v16 = vpack.c.bf16 %v1464_v44, %v1463_v34 }
 0x396   : > { %3569 = vmatpush3.bf16.msra.mxu1 %v1495_v16  ;;  %3832 = vmatprep.mubr.msk.bf16.mxu0 %vm846_vm1, %v1495_v16 }
 0x397   : > { %3833 = vmatmul.mubr.msk.bf16.vlgmr.msra.gmra.mxu0 %vm846_vm1, %v1496_v40 }
 0x398   : > { %3836 = vmatprep.mubr.msk.bf16.mxu0 %vm846_vm1, %v1497_v56 }
 0x399   : > { %1553 = vmatmul.mubr.bf16.vlgmr.msra.gmra.mxu1 %v4335_v17  ;;  %v1518_v17 = vld [vmem:[%s5606_s7 + $0x18] sm:$0xff] }
 0x39a   : > { %1560 = vmatprep.mubr.bf16.mxu1 %v4340_v18  ;;  %3778 = vmatprep.subr.mxu1 %v1518_v17  ;;  %v1517_v18 = vld [vmem:[%s5606_s7 + $0x10] sm:$0xff] }
 0x39b   : > { %3779 = vmatpush3.msra.mxu1 %v1518_v17 }
 0x39c   : > { %3780 = vmatprep.subr.mxu1 %v1517_v18 }
 0x39d   : > { %3781 = vmatpush3.msra.mxu1 %v1517_v18 }
 0x39f   : > { %3837 = vmatmul.mubr.msk.bf16.gmra.mxu0 %vm846_vm1, %v1498_v14  ;;  %v5645_v14 = vld [vmem:[#allocation11_spill] sm:$0xff] }
 0x3a0   : > { %3840 = vmatprep.mubr.msk.bf16.mxu0 %vm846_vm1, %v1499_v61 }
 0x3a1   : > { %1561 = vmatmul.mubr.bf16.gmra.mxu1 %v4347_v19  ;;  %v1516_v19 = vld [vmem:[%s5606_s7 + $0x8] sm:$0xff] }
 0x3a2   : > { %3782 = vmatprep.subr.mxu1 %v1516_v19 }
 0x3a3   : > { %3783 = vmatpush3.msra.mxu1 %v1516_v19 }
 0x3a4   : > { %3784 = vmatprep.subr.mxu1 %v1515_v62 }
 0x3a5   : > { %3785 = vmatpush3.msra.mxu1 %v1515_v62 }
 0x3a7   : > { %3841 = vmatmul.mubr.msk.bf16.gmra.mxu0 %vm846_vm1, %v4777_v60 }
 0x3a8   : > { %3844 = vmatprep.mubr.msk.bf16.mxu0 %vm846_vm1, %v4767_v33 }
 0x3af   : > { %3845 = vmatmul.mubr.msk.bf16.gmra.mxu0 %vm846_vm1, %v4756_v37 }
 0x3b0   : > { %3848 = vmatprep.mubr.msk.bf16.mxu0 %vm846_vm1, %v1503_v1 }
 0x3b7   : > { %3849 = vmatmul.mubr.msk.bf16.gmra.mxu0 %vm846_vm1, %v1504_v51 }
 0x3b8   : > { %3852 = vmatprep.mubr.msk.bf16.mxu0 %vm846_vm1, %v1505_v0  ;;  %v5647_v0 = vld [vmem:[#allocation13_spill] sm:$0xff] }
 0x3bf   : > { %3853 = vmatmul.mubr.msk.bf16.gmra.mxu0 %vm846_vm1, %v1506_v55 }
 0x3c0   : > { %3856 = vmatprep.mubr.msk.bf16.mxu0 %vm846_vm1, %v4780_v6 }
 0x3c7   : > { %3857 = vmatmul.mubr.msk.bf16.gmra.mxu0 %vm846_vm1, %v4770_v32 }
 0x3c8   : > { %3860 = vmatprep.mubr.msk.bf16.mxu0 %vm846_vm1, %v4760_v30 }
 0x3cf   : > { %3861 = vmatmul.mubr.msk.bf16.gmra.mxu0 %vm846_vm1, %v4753_v53 }
 0x457   : > { %v4877_v9 = vpop.f32.mrf.mxu0 }
 0x459   : > { %v3570_v29 = vpop.f32.mrf.mxu1  ;;  %v4879_v21 = vpop.f32.mrf.mxu0 }
 0x45b   : > { %v3571_v2 = vpop.f32.mrf.mxu1  ;;  %v4881_v45 = vpop.f32.mrf.mxu0 }
 0x45c   : > { %v3572_v53 = vadd.f32 %v3571_v2, %v3570_v29 }
 0x45d   : > { %v3573_v37 = vpop.f32.mrf.mxu1  ;;  %v4883_v31 = vpop.f32.mrf.mxu0 }
 0x45e   : > { %3786 = vmatprep.mubr.msk.f32.mxu1 %vm846_vm1, %v3572_v53 }
 0x45f   : > { %v3574_v30 = vpop.f32.mrf.mxu1  ;;  %v4885_v22 = vpop.f32.mrf.mxu0 }
 0x460   : > { %v3575_v33 = vadd.f32 %v3574_v30, %v3573_v37 }
 0x461   : > { %v3576_v32 = vpop.f32.mrf.mxu1  ;;  %v4887_v57 = vpop.f32.mrf.mxu0 }
 0x462   : > { %3787 = vmatmul.mubr.msk.f32.vlgmr.msra.gmra.mxu1 %vm846_vm1, %v3575_v33 }
 0x463   : > { %v3577_v60 = vpop.f32.mrf.mxu1  ;;  %v4889_v56 = vpop.f32.mrf.mxu0 }
 0x464   : > { %v3578_v6 = vadd.f32 %v3577_v60, %v3576_v32 }
 0x465   : > { %v3579_v25 = vpop.f32.mrf.mxu1  ;;  %v4891_v51 = vpop.f32.mrf.mxu0 }
 0x466   : > { %3789 = vmatprep.mubr.msk.f32.mxu1 %vm846_vm1, %v3578_v6 }
 0x467   : > { %v3580_v13 = vpop.f32.mrf.mxu1  ;;  %v3842_v3 = vpop.f32.mrf.mxu0 }
 0x468   : > { %v3581_v12 = vadd.f32 %v3580_v13, %v3579_v25 }
 0x469   : > { %v1965_v26 = vpop.f32.mrf.mxu0 }
 0x46a   : > { %3790 = vmatmul.mubr.msk.f32.gmra.mxu1 %vm846_vm1, %v3581_v12 }
 0x46b   : > { %3796 = vmatprep.mubr.msk.bf16.mxu1 %vm846_vm1, %v4369_v35  ;;  %v5636_v35 = vld [vmem:[#allocation2_spill] sm:$0xff]  ;;  %v3843_v28 = vpop.f32.mrf.mxu0 }
 0x46d   : > { %v1968_v46 = vpop.f32.mrf.mxu0 }
 0x46f   : > { %v3846_v43 = vpop.f32.mrf.mxu0 }
 0x471   : > { %v1981_v40 = vpop.f32.mrf.mxu0 }
 0x473   : > { %v3847_v4 = vpop.f32.mrf.mxu0 }
 0x475   : > { %v1984_v63 = vpop.f32.mrf.mxu0 }
 0x477   : > { %v4895_v15 = vpop.f32.mrf.mxu0 }
 0x479   : > { %v4901_v41 = vpop.f32.mrf.mxu0 }
 0x47b   : > { %v4907_v16 = vpop.f32.mrf.mxu0 }
 0x47d   : > { %v4913_v19 = vpop.f32.mrf.mxu0 }
 0x47f   : > { %v3854_v53 = vpop.f32.mrf.mxu0 }
 0x481   : > { %v4928_v13 = vpop.f32.mrf.mxu0 }
 0x522   : > { %v3788_v20 = vpop.f32.mrf.mxu1 }
 0x523   : > { %v1673_v58 = vsub.f32 %v3345_v42, %v3788_v20 }
 0x524   : > { %v1647_v54 = vpop.f32.mrf.mxu1 }
 0x525   : > { %v1672_v11 = vsub.f32 %v3345_v42, %v1647_v54 }
 0x527   : > { %v1676_v39 = vpack.c.bf16 %v1673_v58, %v1672_v11 }
 0x52a   : > { %v3791_v24 = vpop.f32.mrf.mxu1 }
 0x52b   : > { %v1675_v23 = vsub.f32 %v3345_v42, %v3791_v24 }
 0x52c   : > { %v1657_v61 = vpop.f32.mrf.mxu1 }
 0x52d   : > { %v1674_v55 = vsub.f32 %v3345_v42, %v1657_v61 }
 0x52f   : > { %v1677_v7 = vpack.c.bf16 %v1675_v23, %v1674_v55  ;;  %v3855_v55 = vpop.f32.mrf.mxu0 }
 0x531   : > { %3792 = vmatprep.subr.bf16.mxu1 %v1677_v7 }
 0x532   : > { %3793 = vmatpush3.bf16.msra.mxu1 %v1677_v7 }
 0x533   : > { %3794 = vmatprep.subr.bf16.mxu1 %v1676_v39 }
 0x536   : > { %3795 = vmatpush3.bf16.msra.mxu1 %v1676_v39 }
 0x539   : > { %3797 = vmatmul.mubr.msk.bf16.vlgmr.msra.gmra.mxu1 %vm846_vm1, %v4400_v47  ;;  %v5641_v47 = vld [vmem:[#allocation7_spill] sm:$0xff] }
 0x53a   : > { %3800 = vmatprep.mubr.msk.bf16.mxu1 %vm846_vm1, %v4405_v48  ;;  %v5642_v48 = vld [vmem:[#allocation8_spill] sm:$0xff] }
 0x541   : > { %3801 = vmatmul.mubr.msk.bf16.gmra.mxu1 %vm846_vm1, %v4414_v49  ;;  %v5643_v49 = vld [vmem:[#allocation9_spill] sm:$0xff] }
 0x542   : > { %3804 = vmatprep.mubr.msk.bf16.mxu1 %vm846_vm1, %v5636_v35 }
 0x549   : > { %3805 = vmatmul.mubr.msk.bf16.gmra.mxu1 %vm846_vm1, %v5637_v52 }
 0x54a   : > { %3808 = vmatprep.mubr.msk.bf16.mxu1 %vm846_vm1, %v5638_v38 }
 0x551   : > { %3809 = vmatmul.mubr.msk.bf16.gmra.mxu1 %vm846_vm1, %v5639_v27 }
 0x552   : > { %3812 = vmatprep.mubr.msk.bf16.mxu1 %vm846_vm1, %v5640_v8 }
 0x559   : > { %3813 = vmatmul.mubr.msk.bf16.gmra.mxu1 %vm846_vm1, %v5641_v47  ;;  %v4950_v47 = vpop.f32.mrf.mxu0 }
 0x55a   : > { %3816 = vmatprep.mubr.msk.bf16.mxu1 %vm846_vm1, %v5642_v48 }
 0x561   : > { %3817 = vmatmul.mubr.msk.bf16.gmra.mxu1 %vm846_vm1, %v5643_v49 }
 0x562   : > { %3820 = vmatprep.mubr.msk.bf16.mxu1 %vm846_vm1, %v5644_v5 }
 0x569   : > { %3821 = vmatmul.mubr.msk.bf16.gmra.mxu1 %vm846_vm1, %v5645_v14 }
 0x56a   : > { %3824 = vmatprep.mubr.msk.bf16.mxu1 %vm846_vm1, %v5646_v36 }
 0x571   : > { %3825 = vmatmul.mubr.msk.bf16.gmra.mxu1 %vm846_vm1, %v5647_v0 }
 0x572   : > { %2341 = vmatprep.mubr.bf16.mxu1 %v4193_v59 }
 0x5f9   : > { %v4893_v10 = vpop.f32.mrf.mxu1 }
 0x5fb   : > { %v4897_v50 = vpop.f32.mrf.mxu1 }
 0x5fd   : > { %v4899_v1 = vpop.f32.mrf.mxu1 }
 0x5ff   : > { %v4903_v34 = vpop.f32.mrf.mxu1 }
 0x601   : > { %v4905_v44 = vpop.f32.mrf.mxu1 }
 0x603   : > { %v4909_v17 = vpop.f32.mrf.mxu1 }
 0x605   : > { %v4911_v18 = vpop.f32.mrf.mxu1 }
 0x607   : > { %v4915_v62 = vpop.f32.mrf.mxu1 }
 0x609   : > { %v3806_v29 = vpop.f32.mrf.mxu1 }
 0x60a   : > { %v4917_v2 = vadd.f32 %v3842_v3, %v3806_v29  ;;  %v3858_v3 = vpop.f32.mrf.mxu0 }
 0x60b   : > { %v1744_v37 = vpop.f32.mrf.mxu1 }
 0x60c   : > { %v4919_v30 = vadd.f32 %v1965_v26, %v1744_v37  ;;  %v2070_v33 = vmul.f32 %v4917_v2, %v4917_v2 }
 0x60d   : > { %v3807_v32 = vpop.f32.mrf.mxu1 }
 0x60e   : > { %v4923_v60 = vadd.f32 %v3843_v28, %v3807_v32  ;;  %v2122_v6 = vsel %vm846_vm1, %v2070_v33, 0.0  ;;  %v2068_v25 = vmul.f32 %v4919_v30, %v4919_v30 }
 0x60f   : > { %2123 = vadd.xlane.f32.xlu0 %v2122_v6  ;;  %v1747_v12 = vpop.f32.mrf.mxu1 }
 0x610   : > { %v4930_v20 = vadd.f32 %v1968_v46, %v1747_v12  ;;  %v2071_v54 = vmul.f32 %v4923_v60, %v4923_v60  ;;  %v2116_v61 = vsel %vm846_vm1, %v2068_v25, 0.0 }
 0x611   : > { %v3810_v24 = vpop.f32.mrf.mxu1 }
 0x612   : > { %v4934_v42 = vadd.f32 %v3846_v43, %v3810_v24  ;;  %v2125_v11 = vsel %vm846_vm1, %v2071_v54, 0.0  ;;  %v2069_v23 = vmul.f32 %v4930_v20, %v4930_v20  ;;  %v2029_v43 = vpop.f32.mrf.mxu0 }
 0x613   : > { %2117 = vadd.xlane.f32.xlu0 %v2116_v61  ;;  %2126 = vadd.xlane.f32.xlu1 %v2125_v11  ;;  %v1760_v58 = vpop.f32.mrf.mxu1 }
 0x614   : > { %v4940_v7 = vadd.f32 %v1981_v40, %v1760_v58  ;;  %v2074_v39 = vmul.f32 %v4934_v42, %v4934_v42  ;;  %v2119_v38 = vsel %vm846_vm1, %v2069_v23, 0.0  ;;  %v3859_v29 = vpop.f32.mrf.mxu0 }
 0x615   : > { %v3811_v35 = vpop.f32.mrf.mxu1 }
 0x616   : > { %v4944_v52 = vadd.f32 %v3847_v4, %v3811_v35  ;;  %v2134_v27 = vsel %vm846_vm1, %v2074_v39, 0.0  ;;  %v2072_v8 = vmul.f32 %v4940_v7, %v4940_v7  ;;  %v2032_v12 = vpop.f32.mrf.mxu0 }
 0x617   : > { %2120 = vadd.xlane.f32.xlu1 %v2119_v38  ;;  %2135 = vadd.xlane.f32.xlu0 %v2134_v27  ;;  %v1763_v48 = vpop.f32.mrf.mxu1 }
 0x618   : > { %v4952_v49 = vadd.f32 %v1984_v63, %v1763_v48  ;;  %v2075_v5 = vmul.f32 %v4944_v52, %v4944_v52  ;;  %v2128_v36 = vsel %vm846_vm1, %v2072_v8, 0.0  ;;  %v3862_v23 = vpop.f32.mrf.mxu0 }
 0x619   : > { %v4956_v14 = vpop.f32.mrf.mxu1 }
 0x61a   : > { %v2137_v0 = vsel %vm846_vm1, %v2075_v5, 0.0  ;;  %v2073_v59 = vmul.f32 %v4952_v49, %v4952_v49  ;;  %v2045_v48 = vpop.f32.mrf.mxu0 }
 0x61b   : > { %2129 = vadd.xlane.f32.xlu0 %v2128_v36  ;;  %2138 = vadd.xlane.f32.xlu1 %v2137_v0  ;;  %v4962_v26 = vpop.f32.mrf.mxu1 }
 0x61c   : > { %v2131_v46 = vsel %vm846_vm1, %v2073_v59, 0.0 }
 0x61d   : > { %v4964_v28 = vpop.f32.mrf.mxu1 }
 0x61f   : > { %2132 = vadd.xlane.f32.xlu1 %v2131_v46  ;;  %v4967_v40 = vpop.f32.mrf.mxu1 }
 0x621   : > { %v3818_v4 = vpop.f32.mrf.mxu1 }
 0x622   : > { %v4969_v63 = vadd.f32 %v3854_v53, %v3818_v4 }
 0x623   : > { %v1792_v37 = vpop.f32.mrf.mxu1 }
 0x624   : > { %v2082_v33 = vmul.f32 %v4969_v63, %v4969_v63 }
 0x625   : > { %v3819_v32 = vpop.f32.mrf.mxu1 }
 0x626   : > { %v4973_v6 = vadd.f32 %v3855_v55, %v3819_v32  ;;  %v2158_v25 = vsel %vm846_vm1, %v2082_v33, 0.0 }
 0x627   : > { %2159 = vadd.xlane.f32.xlu0 %v2158_v25  ;;  %v1795_v54 = vpop.f32.mrf.mxu1 }
 0x628   : > { %v2083_v24 = vmul.f32 %v4973_v6, %v4973_v6 }
 0x629   : > { %v3822_v61 = vpop.f32.mrf.mxu1 }
 0x62a   : > { %v4978_v11 = vadd.f32 %v3858_v3, %v3822_v61  ;;  %v2161_v53 = vsel %vm846_vm1, %v2083_v24, 0.0 }
 0x62b   : > { %2162 = vadd.xlane.f32.xlu1 %v2161_v53  ;;  %v1808_v58 = vpop.f32.mrf.mxu1 }
 0x62c   : > { %v4981_v39 = vadd.f32 %v2029_v43, %v1808_v58  ;;  %v2086_v55 = vmul.f32 %v4978_v11, %v4978_v11 }
 0x62d   : > { %v3823_v35 = vpop.f32.mrf.mxu1 }
 0x62e   : > { %v4985_v38 = vadd.f32 %v3859_v29, %v3823_v35  ;;  %v2170_v27 = vsel %vm846_vm1, %v2086_v55, 0.0  ;;  %v2084_v8 = vmul.f32 %v4981_v39, %v4981_v39  ;;  %v3863_v29 = vpop.f32.mrf.mxu0 }
 0x62f   : > { %2171 = vadd.xlane.f32.xlu0 %v2170_v27  ;;  %v1811_v5 = vpop.f32.mrf.mxu1 }
 0x630   : > { %v4990_v36 = vadd.f32 %v2032_v12, %v1811_v5  ;;  %v2087_v0 = vmul.f32 %v4985_v38, %v4985_v38  ;;  %v2164_v46 = vsel %vm846_vm1, %v2084_v8, 0.0  ;;  %v5006_v12 = vadd.f32 %v4885_v22, %v4905_v44  ;;  %v2048_v55 = vpop.f32.mrf.mxu0 }
 0x631   : > { %v3826_v59 = vpop.f32.mrf.mxu1  ;;  %v5020_v44 = vadd.f32 %v4889_v56, %v4911_v18  ;;  %v5037_v18 = vadd.f32 %v4950_v47, %v1795_v54 }
 0x632   : > { %v4994_v3 = vadd.f32 %v3862_v23, %v3826_v59  ;;  %v2173_v43 = vsel %vm846_vm1, %v2087_v0, 0.0  ;;  %v2085_v4 = vmul.f32 %v4990_v36, %v4990_v36  ;;  %v2066_v8 = vmul.f32 %v5006_v12, %v5006_v12 }
 0x633   : > { %2165 = vadd.xlane.f32.xlu0 %v2164_v46  ;;  %2174 = vadd.xlane.f32.xlu1 %v2173_v43  ;;  %v1824_v33 = vpop.f32.mrf.mxu1  ;;  %v5033_v46 = vadd.f32 %v4887_v57, %v4909_v17  ;;  %v2067_v43 = vmul.f32 %v5020_v44, %v5020_v44  ;;  %v5052_v17 = vadd.f32 %v4895_v15, %v4956_v14 }
 0x634   : > { %v5000_v32 = vadd.f32 %v2045_v48, %v1824_v33  ;;  %v2090_v25 = vmul.f32 %v4994_v3, %v4994_v3  ;;  %v2167_v53 = vsel %vm846_vm1, %v2085_v4, 0.0  ;;  %v5025_v48 = vadd.f32 %v4928_v13, %v1792_v37 }
 0x635   : > { %v3827_v24 = vpop.f32.mrf.mxu1  ;;  %v2110_v56 = vsel %vm846_vm1, %v2066_v8, 0.0  ;;  %v5046_v4 = vadd.f32 %v4891_v51, %v4915_v62  ;;  %v2064_v57 = vmul.f32 %v5033_v46, %v5033_v46  ;;  %v2113_v54 = vsel %vm846_vm1, %v2067_v43, 0.0 }
 0x636   : > { %v5008_v61 = vadd.f32 %v3863_v29, %v3827_v24  ;;  %v2182_v23 = vsel %vm846_vm1, %v2090_v25, 0.0  ;;  %v2088_v58 = vmul.f32 %v5000_v32, %v5000_v32  ;;  %v2080_v37 = vmul.f32 %v5025_v48, %v5025_v48 }
 0x637   : > { %2168 = vadd.xlane.f32.xlu1 %v2167_v53  ;;  %2183 = vadd.xlane.f32.xlu0 %v2182_v23  ;;  %v1827_v35 = vpop.f32.mrf.mxu1  ;;  %v2081_v29 = vmul.f32 %v5037_v18, %v5037_v18  ;;  %v5060_v51 = vadd.f32 %v4877_v9, %v4893_v10  ;;  %v2104_v62 = vsel %vm846_vm1, %v2064_v57, 0.0  ;;  %v5065_v33 = vadd.f32 %v4907_v16, %v4964_v28 }
 0x638   : > { %v5014_v27 = vadd.f32 %v2048_v55, %v1827_v35  ;;  %v2091_v22 = vmul.f32 %v5008_v61, %v5008_v61  ;;  %v2176_v5 = vsel %vm846_vm1, %v2088_v58, 0.0  ;;  %v2152_v47 = vsel %vm846_vm1, %v2080_v37, 0.0 }
 0x639   : > { %v2155_v15 = vsel %vm846_vm1, %v2081_v29, 0.0  ;;  %v2078_v14 = vmul.f32 %v5052_v17, %v5052_v17  ;;  %v2065_v25 = vmul.f32 %v5046_v4, %v5046_v4  ;;  %v5074_v9 = vadd.f32 %v4881_v45, %v4899_v1 }
 0x63a   : > { %v2185_v0 = vsel %vm846_vm1, %v2091_v22, 0.0  ;;  %v2089_v59 = vmul.f32 %v5014_v27, %v5014_v27  ;;  %v2062_v10 = vmul.f32 %v5060_v51, %v5060_v51  ;;  %v5080_v16 = vadd.f32 %v4901_v41, %v4962_v26 }
 0x63b   : > { %2177 = vadd.xlane.f32.xlu0 %v2176_v5  ;;  %2186 = vadd.xlane.f32.xlu1 %v2185_v0  ;;  %v2146_v28 = vsel %vm846_vm1, %v2078_v14, 0.0  ;;  %v2107_v24 = vsel %vm846_vm1, %v2065_v25, 0.0  ;;  %v2079_v53 = vmul.f32 %v5065_v33, %v5065_v33  ;;  %v5088_v45 = vadd.f32 %v4879_v21, %v4897_v50  ;;  %v2306_v5 = vld [vmem:[%s5609_s10 + $0x10] sm:$0xff] }
 0x63c   : > { %v2179_v13 = vsel %vm846_vm1, %v2089_v59, 0.0  ;;  %v2098_v1 = vsel %vm846_vm1, %v2062_v10, 0.0  ;;  %v5093_v23 = vadd.f32 %v4913_v19, %v4967_v40  ;;  %v2076_v26 = vmul.f32 %v5080_v16, %v5080_v16 }
 0x63d   : > { %v2149_v41 = vsel %vm846_vm1, %v2079_v53, 0.0  ;;  %v2063_v58 = vmul.f32 %v5074_v9, %v5074_v9  ;;  %v2060_v21 = vmul.f32 %v5088_v45, %v5088_v45  ;;  %v5104_v50 = vadd.f32 %v4883_v31, %v4903_v34  ;;  %v2307_v34 = vld [vmem:[%s5609_s10 + $0x18] sm:$0xff] }
 0x63e   : > { %v2140_v19 = vsel %vm846_vm1, %v2076_v26, 0.0  ;;  %v2077_v55 = vmul.f32 %v5093_v23, %v5093_v23  ;;  %3864 = vmatprep.subr.mxu0 %v2307_v34 }
 0x63f   : > { %2111 = vadd.xlane.f32.xlu0 %v2110_v56  ;;  %2180 = vadd.xlane.f32.xlu1 %v2179_v13  ;;  %v2101_v40 = vsel %vm846_vm1, %v2063_v58, 0.0  ;;  %v2092_v35 = vsel %vm846_vm1, %v2060_v21, 0.0  ;;  %v2061_v8 = vmul.f32 %v5104_v50, %v5104_v50 }
 0x640   : > { %v2143_v22 = vsel %vm846_vm1, %v2077_v55, 0.0  ;;  %3865 = vmatpush3.msra.mxu0 %v2307_v34 }
 0x641   : > { %v2095_v31 = vsel %vm846_vm1, %v2061_v8, 0.0  ;;  %3866 = vmatprep.subr.mxu0 %v2306_v5 }
 0x642   : > { %3867 = vmatpush3.msra.mxu0 %v2306_v5 }
 0x643   : > { %2153 = vadd.xlane.f32.xlu0 %v2152_v47  ;;  %2114 = vadd.xlane.f32.xlu1 %v2113_v54 }
 0x647   : > { %2105 = vadd.xlane.f32.xlu0 %v2104_v62  ;;  %2156 = vadd.xlane.f32.xlu1 %v2155_v15 }
 0x64b   : > { %2147 = vadd.xlane.f32.xlu0 %v2146_v28  ;;  %2108 = vadd.xlane.f32.xlu1 %v2107_v24 }
 0x64f   : > { %2099 = vadd.xlane.f32.xlu0 %v2098_v1  ;;  %2150 = vadd.xlane.f32.xlu1 %v2149_v41 }
 0x653   : > { %2141 = vadd.xlane.f32.xlu0 %v2140_v19  ;;  %2102 = vadd.xlane.f32.xlu1 %v2101_v40 }
 0x657   : > { %2093 = vadd.xlane.f32.xlu0 %v2092_v35  ;;  %2144 = vadd.xlane.f32.xlu1 %v2143_v22 }
 0x65b   : > { %2096 = vadd.xlane.f32.xlu1 %v2095_v31 }
 0x698   : > { %v2124_v0 = vpop.xlane.xlu0 %2123 }
 0x69c   : > { %v2127_v59 = vpop.xlane.xlu1 %2126  ;;  %v2118_v56 = vpop.xlane.xlu0 %2117 }
 0x69d   : > { %4065 = vrsqrt.f32 %v2127_v59 }
 0x6a0   : > { %v2121_v13 = vpop.xlane.xlu1 %2120  ;;  %v2136_v37 = vpop.xlane.xlu0 %2135 }
 0x6a1   : > { %4067 = vrsqrt.f32 %v2136_v37 }
 0x6a4   : > { %v2139_v43 = vpop.xlane.xlu1 %2138  ;;  %v2130_v57 = vpop.xlane.xlu0 %2129 }
 0x6a5   : > { %4069 = vrsqrt.f32 %v2139_v43 }
 0x6a8   : > { %v2133_v47 = vpop.xlane.xlu1 %2132 }
 0x6aa   : > { %v4066_v41 = vpop.eup %4065 }
 0x6ae   : > { %v4068_v21 = vpop.eup %4067 }
 0x6af   : > { %v2234_v59 = vmul.f32 %v4068_v21, %v4934_v42 }
 0x6b0   : > { %v2160_v54 = vpop.xlane.xlu0 %2159 }
 0x6b1   : > { %v2266_v42 = vmax.f32 %v2234_v59, 0.0 }
 0x6b2   : > { %v4070_v19 = vpop.eup %4069 }
 0x6b3   : > { %v2235_v31 = vmul.f32 %v4070_v19, %v4944_v52 }
 0x6b4   : > { %v2163_v29 = vpop.xlane.xlu1 %2162 }
 0x6b8   : > { %v2172_v62 = vpop.xlane.xlu0 %2171 }
 0x6bc   : > { %v2166_v15 = vpop.xlane.xlu0 %2165  ;;  %v2175_v14 = vpop.xlane.xlu1 %2174 }
 0x6c0   : > { %v2169_v25 = vpop.xlane.xlu1 %2168  ;;  %v2184_v10 = vpop.xlane.xlu0 %2183 }
 0x6c1   : > { %4071 = vrsqrt.f32 %v2184_v10  ;;  %v2231_v10 = vmul.f32 %v4066_v41, %v4923_v60 }
 0x6c2   : > { %4073 = vrsqrt.f32 %v2133_v47  ;;  %v2267_v47 = vmax.f32 %v2235_v31, 0.0 }
 0x6c3   : > { %4075 = vrsqrt.f32 %v2175_v14 }
 0x6c4   : > { %v2178_v28 = vpop.xlane.xlu0 %2177  ;;  %v2187_v24 = vpop.xlane.xlu1 %2186 }
 0x6c5   : > { %4077 = vrsqrt.f32 %v2178_v28 }
 0x6c6   : > { %4079 = vrsqrt.f32 %v2187_v24 }
 0x6c7   : > { %4081 = vrsqrt.f32 %v2130_v57 }
 0x6c8   : > { %4083 = vrsqrt.f32 %v2172_v62  ;;  %v2112_v53 = vpop.xlane.xlu0 %2111  ;;  %v2181_v1 = vpop.xlane.xlu1 %2180 }
 0x6c9   : > { %4085 = vrsqrt.f32 %v2169_v25 }
 0x6ca   : > { %4087 = vrsqrt.f32 %v2181_v1 }
 0x6cb   : > { %4089 = vrsqrt.f32 %v2124_v0 }
 0x6cc   : > { %4091 = vrsqrt.f32 %v2166_v15  ;;  %v2154_v26 = vpop.xlane.xlu0 %2153  ;;  %v2115_v58 = vpop.xlane.xlu1 %2114 }
 0x6cd   : > { %4093 = vrsqrt.f32 %v2121_v13 }
 0x6ce   : > { %4095 = vrsqrt.f32 %v2163_v29  ;;  %v4072_v40 = vpop.eup %4071 }
 0x6cf   : > { %4097 = vrsqrt.f32 %v2118_v56  ;;  %v4074_v55 = vpop.eup %4073  ;;  %v2250_v5 = vmul.f32 %v4072_v40, %v4994_v3 }
 0x6d0   : > { %4099 = vrsqrt.f32 %v2160_v54  ;;  %v2106_v35 = vpop.xlane.xlu0 %2105  ;;  %v2157_v22 = vpop.xlane.xlu1 %2156  ;;  %v2233_v54 = vmul.f32 %v4074_v55, %v4952_v49 }
 0x6d1   : > { %v4076_v8 = vpop.eup %4075  ;;  %4101 = vrsqrt.f32 %v2115_v58  ;;  %v2282_v62 = vmax.f32 %v2250_v5, 0.0 }
 0x6d2   : > { %v4078_v34 = vpop.eup %4077  ;;  %4103 = vrsqrt.f32 %v2157_v22  ;;  %v2247_v52 = vmul.f32 %v4076_v8, %v4985_v38 }
 0x6d3   : > { %v4080_v0 = vpop.eup %4079  ;;  %4105 = vrsqrt.f32 %v2112_v53  ;;  %v2248_v15 = vmul.f32 %v4078_v34, %v5000_v32  ;;  %v5134_v32 = vpack.c.bf16 %v2267_v47, %v2266_v42 }
 0x6d4   : > { %v4082_v13 = vpop.eup %4081  ;;  %4107 = vrsqrt.f32 %v2154_v26  ;;  %v2148_v37 = vpop.xlane.xlu0 %2147  ;;  %v2251_v43 = vmul.f32 %v4080_v0, %v5008_v61  ;;  %v2265_v26 = vmax.f32 %v2233_v54, 0.0  ;;  %v2279_v58 = vmax.f32 %v2247_v52, 0.0 }
 0x6d5   : > { %v2109_v56 = vpop.xlane.xlu1 %2108  ;;  %v4084_v57 = vpop.eup %4083  ;;  %v2232_v25 = vmul.f32 %v4082_v13, %v4940_v7  ;;  %v2280_v60 = vmax.f32 %v2248_v15, 0.0  ;;  %v2263_v0 = vmax.f32 %v2231_v10, 0.0 }
 0x6d6   : > { %v4086_v29 = vpop.eup %4085  ;;  %4109 = vrsqrt.f32 %v2109_v56  ;;  %v2283_v3 = vmax.f32 %v2251_v43, 0.0  ;;  %v2246_v53 = vmul.f32 %v4084_v57, %v4978_v11 }
 0x6d7   : > { %v4088_v14 = vpop.eup %4087  ;;  %4111 = vrsqrt.f32 %v2106_v35  ;;  %v2245_v41 = vmul.f32 %v4086_v29, %v4990_v36 }
 0x6d8   : > { %v4090_v61 = vpop.eup %4089  ;;  %4113 = vrsqrt.f32 %v2148_v37  ;;  %v2100_v28 = vpop.xlane.xlu0 %2099  ;;  %v5130_v49 = vpack.c.bf16 %v2283_v3, %v2282_v62  ;;  %v2249_v38 = vmul.f32 %v4088_v14, %v5014_v27  ;;  %v2264_v27 = vmax.f32 %v2232_v25, 0.0 }
 0x6d9   : > { %v2151_v24 = vpop.xlane.xlu1 %2150  ;;  %v4092_v1 = vpop.eup %4091  ;;  %4115 = vrsqrt.f32 %v2100_v28  ;;  %v2230_v11 = vmul.f32 %v4090_v61, %v4917_v2  ;;  %v2278_v8 = vmax.f32 %v2246_v53, 0.0  ;;  %v2277_v13 = vmax.f32 %v2245_v41, 0.0 }
 0x6da   : > { %v4094_v21 = vpop.eup %4093  ;;  %4117 = vrsqrt.f32 %v2151_v24  ;;  %3626 = vmatprep.subr.bf16.mxu1 %v5130_v49  ;;  %v2281_v7 = vmax.f32 %v2249_v38, 0.0  ;;  %v2244_v31 = vmul.f32 %v4092_v1, %v4981_v39  ;;  %v5143_v5 = vpack.c.bf16 %v2265_v26, %v2264_v27 }
 0x6db   : > { %v4096_v19 = vpop.eup %4095  ;;  %3627 = vmatpush3.bf16.msra.mxu1 %v5134_v32  ;;  %v2229_v36 = vmul.f32 %v4094_v21, %v4930_v20  ;;  %v5147_v2 = vpack.c.bf16 %v2279_v58, %v2278_v8  ;;  %v2262_v39 = vmax.f32 %v2230_v11, 0.0 }
 0x6dc   : > { %v4098_v40 = vpop.eup %4097  ;;  %v2142_v55 = vpop.xlane.xlu0 %2141  ;;  %v5140_v22 = vpack.c.bf16 %v2281_v7, %v2280_v60  ;;  %v2243_v37 = vmul.f32 %v4096_v19, %v4973_v6  ;;  %v2276_v54 = vmax.f32 %v2244_v31, 0.0 }
 0x6dd   : > { %v2103_v35 = vpop.xlane.xlu1 %2102  ;;  %v4100_v34 = vpop.eup %4099  ;;  %4119 = vrsqrt.f32 %v2142_v55  ;;  %v2228_v43 = vmul.f32 %v4098_v40, %v4919_v30  ;;  %v5154_v62 = vpack.c.bf16 %v2263_v0, %v2262_v39  ;;  %v2261_v3 = vmax.f32 %v2229_v36, 0.0 }
 0x6de   : > { %v4102_v59 = vpop.eup %4101  ;;  %4121 = vrsqrt.f32 %v2103_v35  ;;  %3628 = vmatprep.subr.bf16.mxu1 %v5140_v22  ;;  %v2242_v52 = vmul.f32 %v4100_v34, %v4969_v63  ;;  %v5157_v15 = vpack.c.bf16 %v2277_v13, %v2276_v54  ;;  %v2275_v14 = vmax.f32 %v2243_v37, 0.0 }
 0x6df   : > { %v4104_v56 = vpop.eup %4103  ;;  %3629 = vmatpush3.bf16.msra.mxu1 %v5143_v5  ;;  %v2227_v6 = vmul.f32 %v4102_v59, %v5020_v44  ;;  %v2260_v25 = vmax.f32 %v2228_v43, 0.0 }
 0x6e0   : > { %v4106_v57 = vpop.eup %4105  ;;  %3630 = vmatprep.subr.bf16.mxu1 %v5147_v2  ;;  %v2094_v47 = vpop.xlane.xlu0 %2093  ;;  %v2241_v30 = vmul.f32 %v4104_v56, %v5037_v18  ;;  %v2274_v28 = vmax.f32 %v2242_v52, 0.0  ;;  %v4194_v52 = vld [vmem:[%s5600_s1] ss:$8 sps:$4 sm:$0xff]  }
 0x6e1   : > { %v2145_v20 = vpop.xlane.xlu1 %2144  ;;  %v4108_v29 = vpop.eup %4107  ;;  %4123 = vrsqrt.f32 %v2094_v47  ;;  %v2226_v10 = vmul.f32 %v4106_v57, %v5006_v12  ;;  %v5164_v38 = vpack.c.bf16 %v2261_v3, %v2260_v25  ;;  %v2259_v53 = vmax.f32 %v2227_v6, 0.0  ;;  %v2304_v3 = vld [vmem:[%s5609_s10] sm:$0xff]  ;;  %v3999_v6 = vld [vmem:[%s5608_s9 + $0x8] sm:$0xff]  }
 0x6e2   : > { %4125 = vrsqrt.f32 %v2145_v20  ;;  %v2240_v24 = vmul.f32 %v4108_v29, %v5025_v48  ;;  %v5167_v26 = vpack.c.bf16 %v2275_v14, %v2274_v28  ;;  %v2273_v58 = vmax.f32 %v2241_v30, 0.0  ;;  %v2305_v29 = vld [vmem:[%s5609_s10 + $0x8] sm:$0xff] }
 0x6e3   : > { %v4110_v42 = vpop.eup %4109  ;;  %3631 = vmatpush3.bf16.msra.mxu1 %v5154_v62  ;;  %v2258_v12 = vmax.f32 %v2226_v10, 0.0  ;;  %3868 = vmatprep.subr.mxu0 %v2305_v29 }
 0x6e4   : > { %v4112_v63 = vpop.eup %4111  ;;  %3632 = vmatprep.subr.bf16.mxu1 %v5157_v15  ;;  %v2225_v18 = vmul.f32 %v4110_v42, %v5046_v4  ;;  %v2272_v48 = vmax.f32 %v2240_v24, 0.0  ;;  %3869 = vmatpush3.msra.mxu0 %v2305_v29 }
 0x6e5   : > { %v2097_v61 = vpop.xlane.xlu1 %2096  ;;  %v4114_v44 = vpop.eup %4113  ;;  %v2224_v60 = vmul.f32 %v4112_v63, %v5033_v46  ;;  %v5174_v19 = vpack.c.bf16 %v2259_v53, %v2258_v12  ;;  %3870 = vmatprep.subr.mxu0 %v2304_v3 }
 0x6e6   : > { %4127 = vrsqrt.f32 %v2097_v61  ;;  %v4116_v1 = vpop.eup %4115  ;;  %v2238_v7 = vmul.f32 %v4114_v44, %v5052_v17  ;;  %v2257_v4 = vmax.f32 %v2225_v18, 0.0  ;;  %v5176_v11 = vpack.c.bf16 %v2273_v58, %v2272_v48  ;;  %3871 = vmatpush3.msra.mxu0 %v2304_v3  ;;  %v4000_v61 = vld [vmem:[%s5608_s9] sm:$0xff]   ;;  %v4200_v48 = vld [vmem:[%s5601_s2 + $0x18] sm:$0xff]  }
 0x6e7   : > { %v4118_v21 = vpop.eup %4117  ;;  %3633 = vmatpush3.bf16.msra.mxu1 %v5164_v38  ;;  %v2222_v55 = vmul.f32 %v4116_v1, %v5060_v51  ;;  %v2256_v46 = vmax.f32 %v2224_v60, 0.0  ;;  %3914 = vmatprep.subr.bf16.mxu0 %v3999_v6 }
 0x6e8   : > { %3634 = vmatprep.subr.bf16.mxu1 %v5167_v26  ;;  %v2239_v41 = vmul.f32 %v4118_v21, %v5065_v33  ;;  %v2270_v8 = vmax.f32 %v2238_v7, 0.0  ;;  %v4201_v7 = vld [vmem:[%s5601_s2 + $0x20] sm:$0xff]  }
 0x6e9   : > { %v2286_v31 = vpack.c.bf16 %v2257_v4, %v2256_v46  ;;  %v2254_v0 = vmax.f32 %v2222_v55, 0.0  ;;  %v4204_v4 = vld [vmem:[%s5601_s2 + $0x38] sm:$0xff]   ;;  %v4210_v46 = vld [vmem:[%s5601_s2 + $0x68] sm:$0xff]  }
 0x6ea   : > { %v4120_v27 = vpop.eup %4119  ;;  %v2271_v40 = vmax.f32 %v2239_v41, 0.0  ;;  %v4202_v41 = vld [vmem:[%s5601_s2 + $0x28] sm:$0xff]   ;;  %v4208_v55 = vld [vmem:[%s5601_s2 + $0x58] sm:$0xff]  }
 0x6eb   : > { %v4122_v35 = vpop.eup %4121  ;;  %3635 = vmatpush3.bf16.msra.mxu1 %v5174_v19  ;;  %v2236_v59 = vmul.f32 %v4120_v27, %v5080_v16  ;;  %v4205_v27 = vld [vmem:[%s5601_s2 + $0x40] sm:$0xff]  }
 0x6ec   : > { %3636 = vmatprep.subr.bf16.mxu1 %v5176_v11  ;;  %v2223_v17 = vmul.f32 %v4122_v35, %v5074_v9  ;;  %v5182_v34 = vpack.c.bf16 %v2271_v40, %v2270_v8  ;;  %v4207_v40 = vld [vmem:[%s5601_s2 + $0x50] sm:$0xff]   ;;  %v4209_v35 = vld [vmem:[%s5601_s2 + $0x60] sm:$0xff]  }
 0x6ed   : > { %v2268_v43 = vmax.f32 %v2236_v59, 0.0  ;;  %v4211_v8 = vld [vmem:[%s5601_s2 + $0x70] sm:$0xff]  }
 0x6ee   : > { %v4124_v33 = vpop.eup %4123  ;;  %v2255_v36 = vmax.f32 %v2223_v17, 0.0  ;;  %v4212_v17 = vld [vmem:[%s5601_s2 + $0x78] sm:$0xff]  }
 0x6ef   : > { %v4126_v13 = vpop.eup %4125  ;;  %3637 = vmatpush3.bf16.msra.mxu1 %v2286_v31  ;;  %v2220_v56 = vmul.f32 %v4124_v33, %v5088_v45  ;;  %v4195_v45 = vld [vmem:[%s5600_s1 + $0x14] ss:$8 sps:$4 sm:$0xff]  }
 0x6f0   : > { %3638 = vmatprep.subr.bf16.mxu1 %v5182_v34  ;;  %v2285_v51 = vpack.c.bf16 %v2255_v36, %v2254_v0  ;;  %v2237_v37 = vmul.f32 %v4126_v13, %v5093_v23  ;;  %v4196_v23 = vld [vmem:[%s5600_s1 + $0x10] ss:$8 sps:$4 sm:$0xff]  }
 0x6f1   : > { %v2252_v20 = vmax.f32 %v2220_v56, 0.0 }
 0x6f2   : > { %v2269_v9 = vmax.f32 %v2237_v37, 0.0 }
 0x6f3   : > { %v4128_v39 = vpop.eup %4127  ;;  %3639 = vmatpush3.bf16.msra.mxu1 %v2285_v51 }
 0x6f4   : > { %v2221_v57 = vmul.f32 %v4128_v39, %v5104_v50  ;;  %v2292_v47 = vpack.c.bf16 %v2269_v9, %v2268_v43  ;;  %v4197_v50 = vld [vmem:[%s5601_s2] sm:$0xff]  }
 0x6f6   : > { %v2253_v54 = vmax.f32 %v2221_v57, 0.0  ;;  %3640 = vmatprep.subr.bf16.mxu1 %v2292_v47 }
 0x6f8   : > { %v2284_v16 = vpack.c.bf16 %v2253_v54, %v2252_v20 }
 0x6fa   : > { %3641 = vmatpush3.bf16.msra.mxu1 %v2284_v16 }
 0x6fd   : > { %2342 = vmatmul.mubr.bf16.vlgmr.msra.gmra.mxu1 %v4194_v52 }
 0x6fe   : > { %2349 = vmatprep.mubr.bf16.mxu1 %v4195_v45 }
 0x705   : > { %2350 = vmatmul.mubr.bf16.gmra.mxu1 %v4196_v23 }
 0x706   : > { %3882 = vmatprep.mubr.msk.bf16.mxu1 %vm846_vm1, %v4197_v50 }
 0x7bd   : > { %v3642_v14 = vpop.f32.mrf.mxu1 }
 0x7bf   : > { %v3643_v30 = vpop.f32.mrf.mxu1 }
 0x7c0   : > { %v3644_v42 = vadd.f32 %v3643_v30, %v3642_v14 }
 0x7c1   : > { %v3645_v25 = vpop.f32.mrf.mxu1 }
 0x7c2   : > { %3872 = vmatprep.mubr.msk.f32.mxu0 %vm846_vm1, %v3644_v42 }
 0x7c3   : > { %v3646_v10 = vpop.f32.mrf.mxu1 }
 0x7c4   : > { %v3647_v63 = vadd.f32 %v3646_v10, %v3645_v25 }
 0x7c5   : > { %v3648_v28 = vpop.f32.mrf.mxu1 }
 0x7c6   : > { %3873 = vmatmul.mubr.msk.f32.vlgmr.msra.gmra.mxu0 %vm846_vm1, %v3647_v63 }
 0x7c7   : > { %v3649_v24 = vpop.f32.mrf.mxu1  ;;  %3915 = vmatpush3.bf16.msra.mxu0 %v3999_v6 }
 0x7c8   : > { %v3650_v44 = vadd.f32 %v3649_v24, %v3648_v28  ;;  %3916 = vmatprep.subr.bf16.mxu0 %v4000_v61 }
 0x7c9   : > { %v3651_v53 = vpop.f32.mrf.mxu1 }
 0x7ca   : > { %3875 = vmatprep.mubr.msk.f32.mxu0 %vm846_vm1, %v3650_v44 }
 0x7cb   : > { %v3652_v18 = vpop.f32.mrf.mxu1  ;;  %3917 = vmatpush3.bf16.msra.mxu0 %v4000_v61 }
 0x7cc   : > { %v3653_v1 = vadd.f32 %v3652_v18, %v3651_v53 }
 0x7ce   : > { %3876 = vmatmul.mubr.msk.f32.gmra.mxu0 %vm846_vm1, %v3653_v1 }
 0x7cf   : > { %3918 = vmatprep.mubr.msk.bf16.mxu0 %vm846_vm1, %v2284_v16 }
 0x7d2   : > { %3919 = vmatmul.mubr.msk.bf16.vlgmr.msra.gmra.mxu0 %vm846_vm1, %v2285_v51 }
 0x7d3   : > { %3922 = vmatprep.mubr.msk.bf16.mxu0 %vm846_vm1, %v2286_v31 }
 0x7da   : > { %3923 = vmatmul.mubr.msk.bf16.gmra.mxu0 %vm846_vm1, %v5174_v19  ;;  %v4203_v19 = vld [vmem:[%s5601_s2 + $0x30] sm:$0xff]  }
 0x7db   : > { %3926 = vmatprep.mubr.msk.bf16.mxu0 %vm846_vm1, %v5164_v38  ;;  %v3384_v38 = vld [vmem:[%s5610_s11] ss:$0 sm:$0xff] }
 0x7e2   : > { %3927 = vmatmul.mubr.msk.bf16.gmra.mxu0 %vm846_vm1, %v5154_v62 }
 0x7e3   : > { %3930 = vmatprep.mubr.msk.bf16.mxu0 %vm846_vm1, %v5143_v5 }
 0x7ea   : > { %3931 = vmatmul.mubr.msk.bf16.gmra.mxu0 %vm846_vm1, %v5134_v32 }
 0x7eb   : > { %3934 = vmatprep.mubr.msk.bf16.mxu0 %vm846_vm1, %v2292_v47 }
 0x7f2   : > { %3935 = vmatmul.mubr.msk.bf16.gmra.mxu0 %vm846_vm1, %v5182_v34 }
 0x7f3   : > { %3938 = vmatprep.mubr.msk.bf16.mxu0 %vm846_vm1, %v5176_v11  ;;  %v4206_v11 = vld [vmem:[%s5601_s2 + $0x48] sm:$0xff]  }
 0x7fa   : > { %3939 = vmatmul.mubr.msk.bf16.gmra.mxu0 %vm846_vm1, %v5167_v26 }
 0x7fb   : > { %3942 = vmatprep.mubr.msk.bf16.mxu0 %vm846_vm1, %v5157_v15 }
 0x802   : > { %3943 = vmatmul.mubr.msk.bf16.gmra.mxu0 %vm846_vm1, %v5147_v2 }
 0x803   : > { %3946 = vmatprep.mubr.msk.bf16.mxu0 %vm846_vm1, %v5140_v22  ;;  %v4199_v22 = vld [vmem:[%s5601_s2 + $0x10] sm:$0xff]  }
 0x80a   : > { %3947 = vmatmul.mubr.msk.bf16.gmra.mxu0 %vm846_vm1, %v5130_v49  ;;  %v4198_v49 = vld [vmem:[%s5601_s2 + $0x8] sm:$0xff]  }
 0x886   : > { %v3874_v32 = vpop.f32.mrf.mxu0 }
 0x887   : > { %v2462_v12 = vsub.f32 %v3384_v38, %v3874_v32 }
 0x888   : > { %v2436_v5 = vpop.f32.mrf.mxu0 }
 0x889   : > { %v2461_v58 = vsub.f32 %v3384_v38, %v2436_v5 }
 0x88b   : > { %v2465_v2 = vpack.c.bf16 %v2462_v12, %v2461_v58 }
 0x88e   : > { %v3877_v62 = vpop.f32.mrf.mxu0 }
 0x88f   : > { %v2464_v21 = vsub.f32 %v3384_v38, %v3877_v62 }
 0x890   : > { %v2446_v26 = vpop.f32.mrf.mxu0 }
 0x891   : > { %v2463_v15 = vsub.f32 %v3384_v38, %v2446_v26 }
 0x892   : > { %v3920_v31 = vpop.f32.mrf.mxu0 }
 0x893   : > { %v2466_v60 = vpack.c.bf16 %v2464_v21, %v2463_v15 }
 0x894   : > { %v2722_v33 = vpop.f32.mrf.mxu0 }
 0x895   : > { %3878 = vmatprep.subr.bf16.mxu1 %v2466_v60 }
 0x896   : > { %3879 = vmatpush3.bf16.msra.mxu1 %v2466_v60  ;;  %v3921_v34 = vpop.f32.mrf.mxu0 }
 0x897   : > { %3880 = vmatprep.subr.bf16.mxu1 %v2465_v2 }
 0x898   : > { %v2725_v0 = vpop.f32.mrf.mxu0 }
 0x89a   : > { %3881 = vmatpush3.bf16.msra.mxu1 %v2465_v2  ;;  %v3924_v36 = vpop.f32.mrf.mxu0 }
 0x89c   : > { %v2738_v59 = vpop.f32.mrf.mxu0 }
 0x89d   : > { %3883 = vmatmul.mubr.msk.bf16.vlgmr.msra.gmra.mxu1 %vm846_vm1, %v4198_v49 }
 0x89e   : > { %3886 = vmatprep.mubr.msk.bf16.mxu1 %vm846_vm1, %v4199_v22  ;;  %v3925_v13 = vpop.f32.mrf.mxu0 }
 0x8a0   : > { %v2741_v51 = vpop.f32.mrf.mxu0 }
 0x8a2   : > { %v3928_v37 = vpop.f32.mrf.mxu0 }
 0x8a4   : > { %v2754_v56 = vpop.f32.mrf.mxu0 }
 0x8a5   : > { %3887 = vmatmul.mubr.msk.bf16.gmra.mxu1 %vm846_vm1, %v4200_v48 }
 0x8a6   : > { %3890 = vmatprep.mubr.msk.bf16.mxu1 %vm846_vm1, %v4201_v7  ;;  %v3929_v39 = vpop.f32.mrf.mxu0 }
 0x8a8   : > { %v2757_v43 = vpop.f32.mrf.mxu0 }
 0x8aa   : > { %v5309_v9 = vpop.f32.mrf.mxu0 }
 0x8ac   : > { %v5311_v57 = vpop.f32.mrf.mxu0 }
 0x8ad   : > { %3891 = vmatmul.mubr.msk.bf16.gmra.mxu1 %vm846_vm1, %v4202_v41 }
 0x8ae   : > { %3894 = vmatprep.mubr.msk.bf16.mxu1 %vm846_vm1, %v4203_v19  ;;  %v5313_v47 = vpop.f32.mrf.mxu0 }
 0x8b0   : > { %v5315_v20 = vpop.f32.mrf.mxu0 }
 0x8b2   : > { %v5319_v52 = vpop.f32.mrf.mxu0 }
 0x8b4   : > { %v5330_v30 = vpop.f32.mrf.mxu0 }
 0x8b5   : > { %3895 = vmatmul.mubr.msk.bf16.gmra.mxu1 %vm846_vm1, %v4204_v4 }
 0x8b6   : > { %3898 = vmatprep.mubr.msk.bf16.mxu1 %vm846_vm1, %v4205_v27  ;;  %v5342_v53 = vpop.f32.mrf.mxu0 }
 0x8b8   : > { %v5354_v21 = vpop.f32.mrf.mxu0 }
 0x8ba   : > { %v3940_v41 = vpop.f32.mrf.mxu0 }
 0x8bd   : > { %3899 = vmatmul.mubr.msk.bf16.gmra.mxu1 %vm846_vm1, %v4206_v11 }
 0x8be   : > { %3902 = vmatprep.mubr.msk.bf16.mxu1 %vm846_vm1, %v4207_v40 }
 0x8c5   : > { %3903 = vmatmul.mubr.msk.bf16.gmra.mxu1 %vm846_vm1, %v4208_v55 }
 0x8c6   : > { %3906 = vmatprep.mubr.msk.bf16.mxu1 %vm846_vm1, %v4209_v35 }
 0x8cd   : > { %3907 = vmatmul.mubr.msk.bf16.gmra.mxu1 %vm846_vm1, %v4210_v46 }
 0x8ce   : > { %3910 = vmatprep.mubr.msk.bf16.mxu1 %vm846_vm1, %v4211_v8  ;;  %v2802_v8 = vpop.f32.mrf.mxu0 }
 0x8d5   : > { %3911 = vmatmul.mubr.msk.bf16.gmra.mxu1 %vm846_vm1, %v4212_v17 }
 0x95d   : > { %v3884_v54 = vpop.f32.mrf.mxu1 }
 0x95e   : > { %v5317_v16 = vadd.f32 %v3920_v31, %v3884_v54 }
 0x95f   : > { %v2501_v45 = vpop.f32.mrf.mxu1 }
 0x960   : > { %v5321_v23 = vadd.f32 %v2722_v33, %v2501_v45  ;;  %v2851_v50 = vmul.f32 %v5317_v16, %v5317_v16 }
 0x961   : > { %v3885_v29 = vpop.f32.mrf.mxu1 }
 0x962   : > { %v5325_v3 = vadd.f32 %v3921_v34, %v3885_v29  ;;  %v2887_v6 = vsel %vm656_vm0, %v2851_v50, 0.0  ;;  %v2849_v14 = vmul.f32 %v5321_v23, %v5321_v23 }
 0x963   : > { %2888 = vadd.xlane.f32.xlu0 %v2887_v6  ;;  %v2504_v42 = vpop.f32.mrf.mxu1 }
 0x964   : > { %v5332_v25 = vadd.f32 %v2725_v0, %v2504_v42  ;;  %v2852_v10 = vmul.f32 %v5325_v3, %v5325_v3  ;;  %v2881_v28 = vsel %vm656_vm0, %v2849_v14, 0.0 }
 0x965   : > { %v3888_v63 = vpop.f32.mrf.mxu1 }
 0x966   : > { %v5336_v61 = vadd.f32 %v3924_v36, %v3888_v63  ;;  %v2890_v24 = vsel %vm656_vm0, %v2852_v10, 0.0  ;;  %v2850_v44 = vmul.f32 %v5332_v25, %v5332_v25 }
 0x967   : > { %2882 = vadd.xlane.f32.xlu0 %v2881_v28  ;;  %2891 = vadd.xlane.f32.xlu1 %v2890_v24  ;;  %v2517_v18 = vpop.f32.mrf.mxu1 }
 0x968   : > { %v5344_v1 = vadd.f32 %v2738_v59, %v2517_v18  ;;  %v2855_v32 = vmul.f32 %v5336_v61, %v5336_v61  ;;  %v2884_v38 = vsel %vm656_vm0, %v2850_v44, 0.0 }
 0x969   : > { %v3889_v5 = vpop.f32.mrf.mxu1 }
 0x96a   : > { %v5348_v62 = vadd.f32 %v3925_v13, %v3889_v5  ;;  %v2899_v26 = vsel %vm656_vm0, %v2855_v32, 0.0  ;;  %v2853_v58 = vmul.f32 %v5344_v1, %v5344_v1 }
 0x96b   : > { %2885 = vadd.xlane.f32.xlu1 %v2884_v38  ;;  %2900 = vadd.xlane.f32.xlu0 %v2899_v26  ;;  %v2520_v15 = vpop.f32.mrf.mxu1 }
 0x96c   : > { %v5356_v12 = vadd.f32 %v2741_v51, %v2520_v15  ;;  %v2856_v60 = vmul.f32 %v5348_v62, %v5348_v62  ;;  %v2893_v22 = vsel %vm656_vm0, %v2853_v58, 0.0  ;;  %v3941_v51 = vpop.f32.mrf.mxu0 }
 0x96d   : > { %v3892_v2 = vpop.f32.mrf.mxu1 }
 0x96e   : > { %v5360_v49 = vadd.f32 %v3928_v37, %v3892_v2  ;;  %v2902_v48 = vsel %vm656_vm0, %v2856_v60, 0.0  ;;  %v2854_v7 = vmul.f32 %v5356_v12, %v5356_v12  ;;  %v2805_v29 = vpop.f32.mrf.mxu0 }
 0x96f   : > { %2894 = vadd.xlane.f32.xlu0 %v2893_v22  ;;  %2903 = vadd.xlane.f32.xlu1 %v2902_v48  ;;  %v2533_v19 = vpop.f32.mrf.mxu1 }
 0x970   : > { %v5366_v4 = vadd.f32 %v2754_v56, %v2533_v19  ;;  %v2859_v27 = vmul.f32 %v5360_v49, %v5360_v49  ;;  %v2896_v55 = vsel %vm656_vm0, %v2854_v7, 0.0  ;;  %v3944_v24 = vpop.f32.mrf.mxu0 }
 0x971   : > { %v3893_v11 = vpop.f32.mrf.mxu1 }
 0x972   : > { %v5370_v40 = vadd.f32 %v3929_v39, %v3893_v11  ;;  %v2911_v35 = vsel %vm656_vm0, %v2859_v27, 0.0  ;;  %v2857_v46 = vmul.f32 %v5366_v4, %v5366_v4  ;;  %v2818_v58 = vpop.f32.mrf.mxu0 }
 0x973   : > { %2897 = vadd.xlane.f32.xlu1 %v2896_v55  ;;  %2912 = vadd.xlane.f32.xlu0 %v2911_v35  ;;  %v2536_v17 = vpop.f32.mrf.mxu1 }
 0x974   : > { %v5376_v31 = vadd.f32 %v2757_v43, %v2536_v17  ;;  %v2860_v33 = vmul.f32 %v5370_v40, %v5370_v40  ;;  %v2905_v36 = vsel %vm656_vm0, %v2857_v46, 0.0  ;;  %v3945_v19 = vpop.f32.mrf.mxu0 }
 0x975   : > { %v3896_v34 = vpop.f32.mrf.mxu1 }
 0x976   : > { %v5381_v0 = vadd.f32 %v5309_v9, %v3896_v34  ;;  %v2914_v59 = vsel %vm656_vm0, %v2860_v33, 0.0  ;;  %v2858_v13 = vmul.f32 %v5376_v31, %v5376_v31  ;;  %v2821_v33 = vpop.f32.mrf.mxu0 }
 0x977   : > { %2906 = vadd.xlane.f32.xlu0 %v2905_v36  ;;  %2915 = vadd.xlane.f32.xlu1 %v2914_v59  ;;  %v2549_v37 = vpop.f32.mrf.mxu1 }
 0x978   : > { %v5388_v56 = vadd.f32 %v5311_v57, %v2549_v37  ;;  %v2863_v39 = vmul.f32 %v5381_v0, %v5381_v0  ;;  %v2908_v54 = vsel %vm656_vm0, %v2858_v13, 0.0 }
 0x979   : > { %v3897_v43 = vpop.f32.mrf.mxu1 }
 0x97a   : > { %v5393_v9 = vadd.f32 %v5313_v47, %v3897_v43  ;;  %v2923_v45 = vsel %vm656_vm0, %v2863_v39, 0.0  ;;  %v2861_v50 = vmul.f32 %v5388_v56, %v5388_v56  ;;  %v3948_v43 = vpop.f32.mrf.mxu0 }
 0x97b   : > { %2909 = vadd.xlane.f32.xlu1 %v2908_v54  ;;  %2924 = vadd.xlane.f32.xlu0 %v2923_v45  ;;  %v2552_v6 = vpop.f32.mrf.mxu1 }
 0x97c   : > { %v5400_v57 = vadd.f32 %v5315_v20, %v2552_v6  ;;  %v2864_v14 = vmul.f32 %v5393_v9, %v5393_v9  ;;  %v2917_v10 = vsel %vm656_vm0, %v2861_v50, 0.0 }
 0x97d   : > { %v3900_v42 = vpop.f32.mrf.mxu1 }
 0x97e   : > { %v5405_v47 = vadd.f32 %v5319_v52, %v3900_v42  ;;  %v2926_v63 = vsel %vm656_vm0, %v2864_v14, 0.0  ;;  %v2862_v28 = vmul.f32 %v5400_v57, %v5400_v57 }
 0x97f   : > { %2918 = vadd.xlane.f32.xlu0 %v2917_v10  ;;  %2927 = vadd.xlane.f32.xlu1 %v2926_v63  ;;  %v2565_v44 = vpop.f32.mrf.mxu1  ;;  %v2834_v63 = vpop.f32.mrf.mxu0 }
 0x980   : > { %v5412_v20 = vadd.f32 %v5330_v30, %v2565_v44  ;;  %v2867_v18 = vmul.f32 %v5405_v47, %v5405_v47  ;;  %v2920_v5 = vsel %vm656_vm0, %v2862_v28, 0.0 }
 0x981   : > { %v3901_v32 = vpop.f32.mrf.mxu1 }
 0x982   : > { %v5417_v52 = vadd.f32 %v5342_v53, %v3901_v32  ;;  %v2935_v38 = vsel %vm656_vm0, %v2867_v18, 0.0  ;;  %v2865_v26 = vmul.f32 %v5412_v20, %v5412_v20 }
 0x983   : > { %2921 = vadd.xlane.f32.xlu1 %v2920_v5  ;;  %2936 = vadd.xlane.f32.xlu0 %v2935_v38  ;;  %v2568_v15 = vpop.f32.mrf.mxu1 }
 0x984   : > { %v5424_v30 = vadd.f32 %v5354_v21, %v2568_v15  ;;  %v2868_v60 = vmul.f32 %v5417_v52, %v5417_v52  ;;  %v2929_v22 = vsel %vm656_vm0, %v2865_v26, 0.0  ;;  %v3949_v26 = vpop.f32.mrf.mxu0 }
 0x985   : > { %v3904_v2 = vpop.f32.mrf.mxu1 }
 0x986   : > { %v5428_v53 = vadd.f32 %v3940_v41, %v3904_v2  ;;  %v2938_v48 = vsel %vm656_vm0, %v2868_v60, 0.0  ;;  %v2866_v7 = vmul.f32 %v5424_v30, %v5424_v30 }
 0x987   : > { %2930 = vadd.xlane.f32.xlu0 %v2929_v22  ;;  %2939 = vadd.xlane.f32.xlu1 %v2938_v48  ;;  %v2581_v27 = vpop.f32.mrf.mxu1 }
 0x988   : > { %v5434_v11 = vadd.f32 %v2802_v8, %v2581_v27  ;;  %v2871_v21 = vmul.f32 %v5428_v53, %v5428_v53  ;;  %v2932_v41 = vsel %vm656_vm0, %v2866_v7, 0.0  ;;  %v2837_v7 = vpop.f32.mrf.mxu0 }
 0x989   : > { %v3905_v55 = vpop.f32.mrf.mxu1 }
 0x98a   : > { %v5438_v35 = vadd.f32 %v3941_v51, %v3905_v55  ;;  %v2947_v46 = vsel %vm656_vm0, %v2871_v21, 0.0  ;;  %v2869_v17 = vmul.f32 %v5434_v11, %v5434_v11 }
 0x98b   : > { %2933 = vadd.xlane.f32.xlu1 %v2932_v41  ;;  %2948 = vadd.xlane.f32.xlu0 %v2947_v46  ;;  %v2584_v34 = vpop.f32.mrf.mxu1 }
 0x98c   : > { %v5444_v36 = vadd.f32 %v2805_v29, %v2584_v34  ;;  %v2872_v8 = vmul.f32 %v5438_v35, %v5438_v35  ;;  %v2941_v51 = vsel %vm656_vm0, %v2869_v17, 0.0 }
 0x98d   : > { %v3908_v59 = vpop.f32.mrf.mxu1 }
 0x98e   : > { %v5448_v13 = vadd.f32 %v3944_v24, %v3908_v59  ;;  %v2950_v37 = vsel %vm656_vm0, %v2872_v8, 0.0  ;;  %v2870_v39 = vmul.f32 %v5444_v36, %v5444_v36 }
 0x98f   : > { %2942 = vadd.xlane.f32.xlu0 %v2941_v51  ;;  %2951 = vadd.xlane.f32.xlu1 %v2950_v37  ;;  %v2597_v54 = vpop.f32.mrf.mxu1 }
 0x990   : > { %v5454_v45 = vadd.f32 %v2818_v58, %v2597_v54  ;;  %v2875_v50 = vmul.f32 %v5448_v13, %v5448_v13  ;;  %v2944_v14 = vsel %vm656_vm0, %v2870_v39, 0.0 }
 0x991   : > { %v3909_v29 = vpop.f32.mrf.mxu1 }
 0x992   : > { %v5458_v6 = vadd.f32 %v3945_v19, %v3909_v29  ;;  %v2959_v42 = vsel %vm656_vm0, %v2875_v50, 0.0  ;;  %v2873_v10 = vmul.f32 %v5454_v45, %v5454_v45 }
 0x993   : > { %2945 = vadd.xlane.f32.xlu1 %v2944_v14  ;;  %2960 = vadd.xlane.f32.xlu0 %v2959_v42  ;;  %v2600_v28 = vpop.f32.mrf.mxu1 }
 0x994   : > { %v5464_v24 = vadd.f32 %v2821_v33, %v2600_v28  ;;  %v2876_v44 = vmul.f32 %v5458_v6, %v5458_v6  ;;  %v2953_v32 = vsel %vm656_vm0, %v2873_v10, 0.0 }
 0x995   : > { %v3912_v18 = vpop.f32.mrf.mxu1 }
 0x996   : > { %v2962_v5 = vsel %vm656_vm0, %v2876_v44, 0.0  ;;  %v2874_v38 = vmul.f32 %v5464_v24, %v5464_v24  ;;  %v5472_v15 = vadd.f32 %v3948_v43, %v3912_v18 }
 0x997   : > { %2954 = vadd.xlane.f32.xlu0 %v2953_v32  ;;  %2963 = vadd.xlane.f32.xlu1 %v2962_v5  ;;  %v2613_v58 = vpop.f32.mrf.mxu1 }
 0x998   : > { %v5474_v60 = vadd.f32 %v2834_v63, %v2613_v58  ;;  %v2956_v22 = vsel %vm656_vm0, %v2874_v38, 0.0  ;;  %v2879_v41 = vmul.f32 %v5472_v15, %v5472_v15 }
 0x999   : > { %v3913_v2 = vpop.f32.mrf.mxu1 }
 0x99a   : > { %v2877_v48 = vmul.f32 %v5474_v60, %v5474_v60  ;;  %v5479_v27 = vadd.f32 %v3949_v26, %v3913_v2  ;;  %v2971_v17 = vsel %vm656_vm0, %v2879_v41, 0.0 }
 0x99b   : > { %2957 = vadd.xlane.f32.xlu1 %v2956_v22  ;;  %v2616_v19 = vpop.f32.mrf.mxu1 }
 0x99c   : > { %v5481_v21 = vadd.f32 %v2837_v7, %v2616_v19  ;;  %v2965_v55 = vsel %vm656_vm0, %v2877_v48, 0.0  ;;  %v2880_v34 = vmul.f32 %v5479_v27, %v5479_v27 }
 0x99d   : > { %2966 = vadd.xlane.f32.xlu0 %v2965_v55 }
 0x99e   : > { %v2878_v46 = vmul.f32 %v5481_v21, %v5481_v21  ;;  %v2974_v8 = vsel %vm656_vm0, %v2880_v34, 0.0 }
 0x9a0   : > { %v2968_v33 = vsel %vm656_vm0, %v2878_v46, 0.0 }
 0x9a1   : > { %2972 = vadd.xlane.f32.xlu0 %v2971_v17  ;;  %2969 = vadd.xlane.f32.xlu1 %v2968_v33 }
 0x9a5   : > { %2975 = vadd.xlane.f32.xlu1 %v2974_v8 }
 0x9ec   : > { %v2889_v59 = vpop.xlane.xlu0 %2888 }
 0x9ed   : > { %4129 = vrsqrt.f32 %v2889_v59 }
 0x9f0   : > { %v2883_v51 = vpop.xlane.xlu0 %2882  ;;  %v2892_v37 = vpop.xlane.xlu1 %2891 }
 0x9f1   : > { %4131 = vrsqrt.f32 %v2883_v51 }
 0x9f2   : > { %4133 = vrsqrt.f32 %v2892_v37 }
 0x9f4   : > { %v2886_v39 = vpop.xlane.xlu1 %2885  ;;  %v2901_v43 = vpop.xlane.xlu0 %2900 }
 0x9f5   : > { %4135 = vrsqrt.f32 %v2886_v39 }
 0x9f6   : > { %4137 = vrsqrt.f32 %v2901_v43 }
 0x9f8   : > { %v2895_v54 = vpop.xlane.xlu0 %2894  ;;  %v2904_v50 = vpop.xlane.xlu1 %2903 }
 0x9f9   : > { %4139 = vrsqrt.f32 %v2895_v54 }
 0x9fa   : > { %v4130_v29 = vpop.eup %4129  ;;  %4141 = vrsqrt.f32 %v2904_v50 }
 0x9fb   : > { %v3011_v14 = vmul.f32 %v4130_v29, %v5317_v16 }
 0x9fc   : > { %v2898_v42 = vpop.xlane.xlu1 %2897  ;;  %v2913_v10 = vpop.xlane.xlu0 %2912 }
 0x9fd   : > { %v3455_v63 = vpack.c.bf16 %v3011_v14, %v3011_v14  ;;  %4143 = vrsqrt.f32 %v2898_v42 }
 0x9fe   : > { %v4132_v28 = vpop.eup %4131  ;;  %4145 = vrsqrt.f32 %v2913_v10 }
 0x9ff   : > { %v4134_v44 = vpop.eup %4133  ;;  %3172 = vst.msk [vmem:[%s5499_s25 + $0x8] sm:$0xf] %vm3169_vm2, %v3455_v63  ;;  %v3009_v16 = vmul.f32 %v4132_v28, %v5321_v23 }
 0xa00   : > { %v3012_v18 = vmul.f32 %v4134_v44, %v5325_v3  ;;  %v2907_v32 = vpop.xlane.xlu0 %2906  ;;  %v2916_v5 = vpop.xlane.xlu1 %2915 }
 0xa01   : > { %v3453_v38 = vpack.c.bf16 %v3009_v16, %v3009_v16  ;;  %4147 = vrsqrt.f32 %v2907_v32 }
 0xa02   : > { %v4136_v26 = vpop.eup %4135  ;;  %v3456_v58 = vpack.c.bf16 %v3012_v18, %v3012_v18  ;;  %4149 = vrsqrt.f32 %v2916_v5 }
 0xa03   : > { %v4138_v2 = vpop.eup %4137  ;;  %3170 = vst.msk [vmem:[%s5499_s25] sm:$0xf] %vm3169_vm2, %v3453_v38  ;;  %v3010_v22 = vmul.f32 %v4136_v26, %v5332_v25 }
 0xa04   : > { %3173 = vst.msk [vmem:[%s5499_s25 + $0xc] sm:$0xf] %vm3169_vm2, %v3456_v58  ;;  %v3015_v23 = vmul.f32 %v4138_v2, %v5336_v61  ;;  %v2910_v48 = vpop.xlane.xlu1 %2909  ;;  %v2925_v3 = vpop.xlane.xlu0 %2924 }
 0xa05   : > { %v3454_v7 = vpack.c.bf16 %v3010_v22, %v3010_v22  ;;  %4151 = vrsqrt.f32 %v2910_v48 }
 0xa06   : > { %v4140_v19 = vpop.eup %4139  ;;  %v3459_v55 = vpack.c.bf16 %v3015_v23, %v3015_v23  ;;  %4153 = vrsqrt.f32 %v2925_v3 }
 0xa07   : > { %v4142_v41 = vpop.eup %4141  ;;  %3171 = vst.msk [vmem:[%s5499_s25 + $0x4] sm:$0xf] %vm3169_vm2, %v3454_v7  ;;  %v3013_v46 = vmul.f32 %v4140_v19, %v5344_v1 }
 0xa08   : > { %3176 = vst.msk [vmem:[%s5499_s25 + $0x18] sm:$0xf] %vm3169_vm2, %v3459_v55  ;;  %v3016_v25 = vmul.f32 %v4142_v41, %v5348_v62  ;;  %v2919_v17 = vpop.xlane.xlu0 %2918  ;;  %v2928_v61 = vpop.xlane.xlu1 %2927 }
 0xa09   : > { %v3457_v33 = vpack.c.bf16 %v3013_v46, %v3013_v46  ;;  %4155 = vrsqrt.f32 %v2919_v17 }
 0xa0a   : > { %v4144_v34 = vpop.eup %4143  ;;  %v3460_v8 = vpack.c.bf16 %v3016_v25, %v3016_v25  ;;  %4157 = vrsqrt.f32 %v2928_v61 }
 0xa0b   : > { %v4146_v59 = vpop.eup %4145  ;;  %3174 = vst.msk [vmem:[%s5499_s25 + $0x10] sm:$0xf] %vm3169_vm2, %v3457_v33  ;;  %v3014_v51 = vmul.f32 %v4144_v34, %v5356_v12 }
 0xa0c   : > { %3177 = vst.msk [vmem:[%s5499_s25 + $0x1c] sm:$0xf] %vm3169_vm2, %v3460_v8  ;;  %v3019_v1 = vmul.f32 %v4146_v59, %v5360_v49  ;;  %v2922_v37 = vpop.xlane.xlu1 %2921  ;;  %v2937_v62 = vpop.xlane.xlu0 %2936 }
 0xa0d   : > { %v3458_v39 = vpack.c.bf16 %v3014_v51, %v3014_v51  ;;  %4159 = vrsqrt.f32 %v2922_v37 }
 0xa0e   : > { %v4148_v43 = vpop.eup %4147  ;;  %v3463_v54 = vpack.c.bf16 %v3019_v1, %v3019_v1  ;;  %4161 = vrsqrt.f32 %v2937_v62 }
 0xa0f   : > { %v4150_v50 = vpop.eup %4149  ;;  %3175 = vst.msk [vmem:[%s5499_s25 + $0x14] sm:$0xf] %vm3169_vm2, %v3458_v39  ;;  %v3017_v29 = vmul.f32 %v4148_v43, %v5366_v4 }
 0xa10   : > { %3180 = vst.msk [vmem:[%s5499_s25 + $0x28] sm:$0xf] %vm3169_vm2, %v3463_v54  ;;  %v3020_v12 = vmul.f32 %v4150_v50, %v5370_v40  ;;  %v2931_v14 = vpop.xlane.xlu0 %2930  ;;  %v2940_v49 = vpop.xlane.xlu1 %2939 }
 0xa11   : > { %v3461_v42 = vpack.c.bf16 %v3017_v29, %v3017_v29  ;;  %4163 = vrsqrt.f32 %v2931_v14 }
 0xa12   : > { %v4152_v10 = vpop.eup %4151  ;;  %v3464_v63 = vpack.c.bf16 %v3020_v12, %v3020_v12  ;;  %4165 = vrsqrt.f32 %v2940_v49 }
 0xa13   : > { %v4154_v28 = vpop.eup %4153  ;;  %3178 = vst.msk [vmem:[%s5499_s25 + $0x20] sm:$0xf] %vm3169_vm2, %v3461_v42  ;;  %v3018_v44 = vmul.f32 %v4152_v10, %v5376_v31 }
 0xa14   : > { %3181 = vst.msk [vmem:[%s5499_s25 + $0x2c] sm:$0xf] %vm3169_vm2, %v3464_v63  ;;  %v3023_v4 = vmul.f32 %v4154_v28, %v5381_v0  ;;  %v2934_v16 = vpop.xlane.xlu1 %2933  ;;  %v2949_v40 = vpop.xlane.xlu0 %2948 }
 0xa15   : > { %v3462_v18 = vpack.c.bf16 %v3018_v44, %v3018_v44  ;;  %4167 = vrsqrt.f32 %v2934_v16 }
 0xa16   : > { %v4156_v32 = vpop.eup %4155  ;;  %v3467_v5 = vpack.c.bf16 %v3023_v4, %v3023_v4  ;;  %4169 = vrsqrt.f32 %v2949_v40 }
 0xa17   : > { %v4158_v38 = vpop.eup %4157  ;;  %3179 = vst.msk [vmem:[%s5499_s25 + $0x24] sm:$0xf] %vm3169_vm2, %v3462_v18  ;;  %v3021_v26 = vmul.f32 %v4156_v32, %v5388_v56 }
 0xa18   : > { %3184 = vst.msk [vmem:[%s5499_s25 + $0x38] sm:$0xf] %vm3169_vm2, %v3467_v5  ;;  %v3024_v31 = vmul.f32 %v4158_v38, %v5393_v9  ;;  %v2943_v58 = vpop.xlane.xlu0 %2942  ;;  %v2952_v0 = vpop.xlane.xlu1 %2951 }
 0xa19   : > { %v3465_v2 = vpack.c.bf16 %v3021_v26, %v3021_v26  ;;  %4171 = vrsqrt.f32 %v2943_v58 }
 0xa1a   : > { %v4160_v22 = vpop.eup %4159  ;;  %v3468_v23 = vpack.c.bf16 %v3024_v31, %v3024_v31  ;;  %4173 = vrsqrt.f32 %v2952_v0 }
 0xa1b   : > { %v4162_v48 = vpop.eup %4161  ;;  %3182 = vst.msk [vmem:[%s5499_s25 + $0x30] sm:$0xf] %vm3169_vm2, %v3465_v2  ;;  %v3022_v3 = vmul.f32 %v4160_v22, %v5400_v57 }
 0xa1c   : > { %3185 = vst.msk [vmem:[%s5499_s25 + $0x3c] sm:$0xf] %vm3169_vm2, %v3468_v23  ;;  %v3027_v56 = vmul.f32 %v4162_v48, %v5405_v47  ;;  %v2946_v7 = vpop.xlane.xlu1 %2945  ;;  %v2961_v9 = vpop.xlane.xlu0 %2960 }
 0xa1d   : > { %v3466_v19 = vpack.c.bf16 %v3022_v3, %v3022_v3  ;;  %4175 = vrsqrt.f32 %v2946_v7 }
 0xa1e   : > { %v4164_v55 = vpop.eup %4163  ;;  %v3471_v41 = vpack.c.bf16 %v3027_v56, %v3027_v56  ;;  %4177 = vrsqrt.f32 %v2961_v9 }
 0xa1f   : > { %v4166_v46 = vpop.eup %4165  ;;  %3183 = vst.msk [vmem:[%s5499_s25 + $0x34] sm:$0xf] %vm3169_vm2, %v3466_v19  ;;  %v3025_v25 = vmul.f32 %v4164_v55, %v5412_v20 }
 0xa20   : > { %3188 = vst.msk [vmem:[%s5499_s25 + $0x48] sm:$0xf] %vm3169_vm2, %v3471_v41  ;;  %v3028_v57 = vmul.f32 %v4166_v46, %v5417_v52  ;;  %v2955_v17 = vpop.xlane.xlu0 %2954  ;;  %v2964_v47 = vpop.xlane.xlu1 %2963 }
 0xa21   : > { %v3469_v61 = vpack.c.bf16 %v3025_v25, %v3025_v25  ;;  %4179 = vrsqrt.f32 %v2955_v17 }
 0xa22   : > { %v4168_v33 = vpop.eup %4167  ;;  %v3472_v34 = vpack.c.bf16 %v3028_v57, %v3028_v57  ;;  %4181 = vrsqrt.f32 %v2964_v47 }
 0xa23   : > { %v4170_v8 = vpop.eup %4169  ;;  %3186 = vst.msk [vmem:[%s5499_s25 + $0x40] sm:$0xf] %vm3169_vm2, %v3469_v61  ;;  %v3026_v59 = vmul.f32 %v4168_v33, %v5424_v30 }
 0xa24   : > { %3189 = vst.msk [vmem:[%s5499_s25 + $0x4c] sm:$0xf] %vm3169_vm2, %v3472_v34  ;;  %v3031_v20 = vmul.f32 %v4170_v8, %v5428_v53  ;;  %v2958_v51 = vpop.xlane.xlu1 %2957 }
 0xa25   : > { %v3470_v52 = vpack.c.bf16 %v3026_v59, %v3026_v59  ;;  %4183 = vrsqrt.f32 %v2958_v51 }
 0xa26   : > { %v4172_v1 = vpop.eup %4171  ;;  %v3475_v37 = vpack.c.bf16 %v3031_v20, %v3031_v20  ;;  %v2967_v62 = vpop.xlane.xlu0 %2966 }
 0xa27   : > { %v4174_v39 = vpop.eup %4173  ;;  %3187 = vst.msk [vmem:[%s5499_s25 + $0x44] sm:$0xf] %vm3169_vm2, %v3470_v52  ;;  %v3029_v43 = vmul.f32 %v4172_v1, %v5434_v11  ;;  %4185 = vrsqrt.f32 %v2967_v62 }
 0xa28   : > { %3192 = vst.msk [vmem:[%s5499_s25 + $0x58] sm:$0xf] %vm3169_vm2, %v3475_v37  ;;  %v3032_v30 = vmul.f32 %v4174_v39, %v5438_v35 }
 0xa29   : > { %v3473_v54 = vpack.c.bf16 %v3029_v43, %v3029_v43 }
 0xa2a   : > { %v4176_v53 = vpop.eup %4175  ;;  %v3476_v50 = vpack.c.bf16 %v3032_v30, %v3032_v30  ;;  %v2973_v29 = vpop.xlane.xlu0 %2972 }
 0xa2b   : > { %v2970_v12 = vpop.xlane.xlu1 %2969  ;;  %v4178_v14 = vpop.eup %4177  ;;  %3190 = vst.msk [vmem:[%s5499_s25 + $0x50] sm:$0xf] %vm3169_vm2, %v3473_v54  ;;  %v3030_v49 = vmul.f32 %v4176_v53, %v5444_v36  ;;  %4187 = vrsqrt.f32 %v2973_v29 }
 0xa2c   : > { %3193 = vst.msk [vmem:[%s5499_s25 + $0x5c] sm:$0xf] %vm3169_vm2, %v3476_v50  ;;  %v3035_v11 = vmul.f32 %v4178_v14, %v5448_v13  ;;  %4189 = vrsqrt.f32 %v2970_v12 }
 0xa2d   : > { %v3474_v35 = vpack.c.bf16 %v3030_v49, %v3030_v49 }
 0xa2e   : > { %v4180_v42 = vpop.eup %4179  ;;  %v3479_v10 = vpack.c.bf16 %v3035_v11, %v3035_v11 }
 0xa2f   : > { %v2976_v63 = vpop.xlane.xlu1 %2975  ;;  %v4182_v28 = vpop.eup %4181  ;;  %3191 = vst.msk [vmem:[%s5499_s25 + $0x54] sm:$0xf] %vm3169_vm2, %v3474_v35  ;;  %v3033_v44 = vmul.f32 %v4180_v42, %v5454_v45 }
 0xa30   : > { %4191 = vrsqrt.f32 %v2976_v63  ;;  %3196 = vst.msk [vmem:[%s5499_s25 + $0x68] sm:$0xf] %vm3169_vm2, %v3479_v10  ;;  %v3036_v36 = vmul.f32 %v4182_v28, %v5458_v6 }
 0xa31   : > { %v3477_v4 = vpack.c.bf16 %v3033_v44, %v3033_v44 }
 0xa32   : > { %v4184_v13 = vpop.eup %4183  ;;  %v3480_v16 = vpack.c.bf16 %v3036_v36, %v3036_v36 }
 0xa33   : > { %3194 = vst.msk [vmem:[%s5499_s25 + $0x60] sm:$0xf] %vm3169_vm2, %v3477_v4  ;;  %v3034_v40 = vmul.f32 %v4184_v13, %v5464_v24 }
 0xa34   : > { %v4186_v18 = vpop.eup %4185  ;;  %3197 = vst.msk [vmem:[%s5499_s25 + $0x6c] sm:$0xf] %vm3169_vm2, %v3480_v16 }
 0xa35   : > { %v3478_v32 = vpack.c.bf16 %v3034_v40, %v3034_v40  ;;  %v3037_v45 = vmul.f32 %v4186_v18, %v5474_v60 }
 0xa37   : > { %3195 = vst.msk [vmem:[%s5499_s25 + $0x64] sm:$0xf] %vm3169_vm2, %v3478_v32  ;;  %v3481_v5 = vpack.c.bf16 %v3037_v45, %v3037_v45 }
 0xa38   : > { %v4188_v6 = vpop.eup %4187 }
 0xa39   : > { %v4190_v38 = vpop.eup %4189  ;;  %3198 = vst.msk [vmem:[%s5499_s25 + $0x70] sm:$0xf] %vm3169_vm2, %v3481_v5  ;;  %v3039_v26 = vmul.f32 %v4188_v6, %v5472_v15 }
 0xa3a   : > { %v3038_v31 = vmul.f32 %v4190_v38, %v5481_v21 }
 0xa3b   : > { %v3483_v24 = vpack.c.bf16 %v3039_v26, %v3039_v26 }
 0xa3c   : > { %v3482_v0 = vpack.c.bf16 %v3038_v31, %v3038_v31 }
 0xa3d   : > { %v4192_v58 = vpop.eup %4191  ;;  %3200 = vst.msk [vmem:[%s5499_s25 + $0x78] sm:$0xf] %vm3169_vm2, %v3483_v24 }
 0xa3e   : > { %v3040_v2 = vmul.f32 %v4192_v58, %v5479_v27  ;;  %3199 = vst.msk [vmem:[%s5499_s25 + $0x74] sm:$0xf] %vm3169_vm2, %v3482_v0 }
 0xa40   : > { %v3484_v60 = vpack.c.bf16 %v3040_v2, %v3040_v2 }
 0xa42   : > { %3201 = vst.msk [vmem:[%s5499_s25 + $0x7c] sm:$0xf] %vm3169_vm2, %v3484_v60 }
 0xa43 PF: > { %s22_s21 = sadd.s32 1, %s4219_s21  }
 0xa44   : > { %p19_p4 = scmp.ge.s32.totalorder %s22_s21, 4  }
 0xa46   :  { %21 = sbr.rel (!%p19_p4) target bundleno = 1 (0x1), region = 98 }

</bundles_post_ra>
